<compile_context>
chip_gen: v6e
topology: v6e:2x2x1
jax: 0.10.0
libtpu: 0.0.40
codegen_flags: <defaults>
</compile_context>

<pallas_src>
import jax
import jax.numpy as jnp
from jax import lax
from jax.experimental import pallas as pl
from jax.experimental.pallas import tpu as pltpu

_EPS = 1e-12  # torch.nn.functional.normalize default


# ----------------------------- kernel ---------------------------------------


def _l2_normalize(y):
    # torch: y / max(||y||_2, eps)
    #   ||y|| >  eps  ->  y * rsqrt(sum(y^2))   (EUP rsqrt + VPU mul)
    #   ||y|| <= eps  ->  y * (1/eps)
    sumsq = jnp.sum(y * y, axis=-1, keepdims=True)
    eps2 = _EPS * _EPS
    inv = jnp.where(sumsq > eps2, lax.rsqrt(jnp.maximum(sumsq, eps2)), 1.0 / _EPS)
    return y * inv


def fused_av_kernel(stft_ref, vis_ref,
                    w_enc_ref, b_enc_ref,
                    w_a_ref, b_a_ref,
                    w_v_ref, b_v_ref,
                    out_ref):
    branch = pl.program_id(0)  # 0 = audio branch, 1 = visual branch

    @pl.when(branch == 0)
    def _audio_branch():
        stft = stft_ref[...]                                   # [B, F, T] f32
        # Time mean-pool.  T=16 is the minor axis so this is a tiny XLU
        # reduce — negligible here; switch to a time-major layout / fold the
        # pool into the matmul if T grows into the hundreds.
        pooled = jnp.sum(stft, axis=-1) * (1.0 / stft.shape[-1])        # [B, F]
        feat = jnp.dot(pooled, w_enc_ref[...].astype(jnp.float32),
                       preferred_element_type=jnp.float32) + b_enc_ref[...]
        y = jnp.dot(feat, w_a_ref[...].astype(jnp.float32),
                    preferred_element_type=jnp.float32) + b_a_ref[...]  # [B, P]
        out_ref[0, :, :] = _l2_normalize(y).astype(out_ref.dtype)

    @pl.when(branch == 1)
    def _visual_branch():
        y = jnp.dot(vis_ref[...], w_v_ref[...].astype(jnp.float32),
                    preferred_element_type=jnp.float32) + b_v_ref[...]  # [B, P]
        out_ref[0, :, :] = _l2_normalize(y).astype(out_ref.dtype)


# ----------------------------- wrapper ---------------------------------------


def av_contrastive_forward(params, visual_features_pooled, audio_stft):
    """Mirrors AVContrastiveModel.forward — returns (visual_embedding, audio_embedding)."""
    B, V = visual_features_pooled.shape
    _, F, T = audio_stft.shape
    Da = params["w_enc"].shape[1]
    P = params["w_audio"].shape[1]

    flops = 2 * B * (F * T + F * Da + Da * P + V * P)
    bytes_accessed = (
        audio_stft.size * audio_stft.dtype.itemsize
        + visual_features_pooled.size * visual_features_pooled.dtype.itemsize
        + sum(int(p.size) * p.dtype.itemsize for p in params.values())
        + 2 * B * P * 4
    )

    def _full(a):
        # Whole-array block, resident across the (parallel) branch axis.
        return pl.BlockSpec(a.shape, lambda i, _nd=a.ndim: (0,) * _nd)

    out = pl.pallas_call(
        fused_av_kernel,
        out_shape=jax.ShapeDtypeStruct((2, B, P), jnp.float32),
        grid_spec=pltpu.PrefetchScalarGridSpec(
            num_scalar_prefetch=0,
            grid=(2,),
            in_specs=[
                _full(audio_stft),
                _full(visual_features_pooled),
                _full(params["w_enc"]), _full(params["b_enc"]),
                _full(params["w_audio"]), _full(params["b_audio"]),
                _full(params["w_visual"]), _full(params["b_visual"]),
            ],
            out_specs=pl.BlockSpec((1, B, P), lambda i: (i, 0, 0)),
        ),
        compiler_params=pltpu.CompilerParams(
            dimension_semantics=("parallel",)),
        cost_estimate=pl.CostEstimate(flops=flops,
                                      transcendentals=2 * B,
                                      bytes_accessed=bytes_accessed),
    )(audio_stft, visual_features_pooled,
      params["w_enc"], params["b_enc"],
      params["w_audio"], params["b_audio"],
      params["w_visual"], params["b_visual"])

    audio_embedding = out[0]
    visual_embedding = out[1]
    return visual_embedding, audio_embedding


# ----------------------------- main ------------------------------------------


if __name__ == "__main__":
    # Module-default feature dims; small batch / spectrogram.  B=8 keeps the
    # matmul M dim a multiple of the 8-row sublane (no masked stores).
    B = 8
    N_FREQ = 64
    N_TIME = 16
    VISUAL_DIM = 512
    AUDIO_DIM = 768
    PROJ_DIM = 256

    key = jax.random.PRNGKey(0)
    k_vx, k_ax, k_we, k_be, k_wa, k_ba, k_wv, k_bv = jax.random.split(key, 8)

    # Weights stored [in, out] as bf16 (halves weight DMA); biases f32, (1, D).
    params = {
        "w_enc":    (jax.random.normal(k_we, (N_FREQ, AUDIO_DIM), jnp.float32) * 0.02
                     ).astype(jnp.bfloat16),
        "b_enc":    jax.random.normal(k_be, (1, AUDIO_DIM), jnp.float32) * 0.02,
        "w_audio":  (jax.random.normal(k_wa, (AUDIO_DIM, PROJ_DIM), jnp.float32) * 0.02
                     ).astype(jnp.bfloat16),
        "b_audio":  jax.random.normal(k_ba, (1, PROJ_DIM), jnp.float32) * 0.02,
        "w_visual": (jax.random.normal(k_wv, (VISUAL_DIM, PROJ_DIM), jnp.float32) * 0.02
                     ).astype(jnp.bfloat16),
        "b_visual": jax.random.normal(k_bv, (1, PROJ_DIM), jnp.float32) * 0.02,
    }

    visual_features_pooled = jax.random.normal(k_vx, (B, VISUAL_DIM), jnp.float32)
    audio_stft = jax.random.normal(k_ax, (B, N_FREQ, N_TIME), jnp.float32)

    visual_emb, audio_emb = av_contrastive_forward(
        params, visual_features_pooled, audio_stft)
    jax.block_until_ready((visual_emb, audio_emb))

    # Pure-JAX reference (same bf16-quantized weights so rounding cancels).
    def ref_forward(p, vx, stft):
        w_enc = p["w_enc"].astype(jnp.float32)
        w_a = p["w_audio"].astype(jnp.float32)
        w_v = p["w_visual"].astype(jnp.float32)
        af = jnp.mean(stft, axis=-1) @ w_enc + p["b_enc"]
        ae = af @ w_a + p["b_audio"]
        ve = vx @ w_v + p["b_visual"]
        ae = ae / jnp.maximum(jnp.linalg.norm(ae, axis=-1, keepdims=True), _EPS)
        ve = ve / jnp.maximum(jnp.linalg.norm(ve, axis=-1, keepdims=True), _EPS)
        return ve, ae

    ve_ref, ae_ref = ref_forward(params, visual_features_pooled, audio_stft)
    assert visual_emb.shape == (B, PROJ_DIM) and audio_emb.shape == (B, PROJ_DIM)
    assert jnp.allclose(visual_emb, ve_ref, atol=1e-4), "visual embedding mismatch"
    assert jnp.allclose(audio_emb, ae_ref, atol=1e-4), "audio embedding mismatch"

    print("KERNEL_OK")
</pallas_src>

<mosaic_0001>
module attributes {stable_mosaic.version = 11 : i64} {
  func.func @fused_av_kernel(%arg0: i32, %arg1: memref<8x64x16xf32, #tpu.memory_space<vmem>>, %arg2: memref<8x512xf32, #tpu.memory_space<vmem>>, %arg3: memref<64x768xbf16, #tpu.memory_space<vmem>>, %arg4: memref<1x768xf32, #tpu.memory_space<vmem>>, %arg5: memref<768x256xbf16, #tpu.memory_space<vmem>>, %arg6: memref<1x256xf32, #tpu.memory_space<vmem>>, %arg7: memref<512x256xbf16, #tpu.memory_space<vmem>>, %arg8: memref<1x256xf32, #tpu.memory_space<vmem>>, %arg9: memref<1x8x256xf32, #tpu.memory_space<vmem>>) attributes {dimension_semantics = [#tpu.dimension_semantics<parallel>], iteration_bounds = array<i64: 2>, scalar_prefetch = 0 : i64, scratch_operands = 0 : i64, tpu.core_type = #tpu.core_type<tc>, window_params = [{pipeline_mode = #tpu.pipeline_mode<synchronous>, transform_indices = @transform_0, window_bounds = array<i64: 8, 64, 16>}, {pipeline_mode = #tpu.pipeline_mode<synchronous>, transform_indices = @transform_1, window_bounds = array<i64: 8, 512>}, {pipeline_mode = #tpu.pipeline_mode<synchronous>, transform_indices = @transform_2, window_bounds = array<i64: 64, 768>}, {pipeline_mode = #tpu.pipeline_mode<synchronous>, transform_indices = @transform_3, window_bounds = array<i64: 1, 768>}, {pipeline_mode = #tpu.pipeline_mode<synchronous>, transform_indices = @transform_4, window_bounds = array<i64: 768, 256>}, {pipeline_mode = #tpu.pipeline_mode<synchronous>, transform_indices = @transform_5, window_bounds = array<i64: 1, 256>}, {pipeline_mode = #tpu.pipeline_mode<synchronous>, transform_indices = @transform_6, window_bounds = array<i64: 512, 256>}, {pipeline_mode = #tpu.pipeline_mode<synchronous>, transform_indices = @transform_7, window_bounds = array<i64: 1, 256>}, {transform_indices = @transform_8, window_bounds = array<i64: 1, 8, 256>}]} {
    %c0_i32 = arith.constant 0 : i32
    %0 = arith.cmpi eq, %arg0, %c0_i32 : i32
    %1 = arith.extui %0 : i1 to i32
    %c0_i32_0 = arith.constant 0 : i32
    %2 = arith.cmpi ne, %1, %c0_i32_0 : i32
    scf.if %2 {
      %c0 = arith.constant 0 : index
      %c0_2 = arith.constant 0 : index
      %c0_3 = arith.constant 0 : index
      %6 = vector.load %arg1[%c0, %c0_2, %c0_3] : memref<8x64x16xf32, #tpu.memory_space<vmem>>, vector<8x64x16xf32>
      %cst = arith.constant dense<0.000000e+00> : vector<8x64xf32>
      %7 = vector.multi_reduction <add>, %6, %cst [2] : vector<8x64x16xf32> to vector<8x64xf32>
      %cst_4 = arith.constant 6.250000e-02 : f32
      %8 = vector.broadcast %cst_4 : f32 to vector<8x64xf32>
      %9 = arith.mulf %7, %8 : vector<8x64xf32>
      %c0_5 = arith.constant 0 : index
      %c0_6 = arith.constant 0 : index
      %10 = vector.load %arg3[%c0_5, %c0_6] : memref<64x768xbf16, #tpu.memory_space<vmem>>, vector<64x768xbf16>
      %11 = arith.extf %10 : vector<64x768xbf16> to vector<64x768xf32>
      %cst_7 = arith.constant dense<0.000000e+00> : vector<8x768xf32>
      %12 = tpu.matmul %9, %11, %cst_7 {dimension_numbers = #tpu.dot_dimension_numbers<[1], [0], [0], [1], [0, 0, 1, 1], [], []>} : vector<8x64xf32>, vector<64x768xf32>, vector<8x768xf32> -> vector<8x768xf32>
      %c0_8 = arith.constant 0 : index
      %c0_9 = arith.constant 0 : index
      %13 = vector.load %arg4[%c0_8, %c0_9] : memref<1x768xf32, #tpu.memory_space<vmem>>, vector<1x768xf32>
      %14 = vector.broadcast %13 : vector<1x768xf32> to vector<8x768xf32>
      %15 = arith.addf %12, %14 : vector<8x768xf32>
      %c0_10 = arith.constant 0 : index
      %c0_11 = arith.constant 0 : index
      %16 = vector.load %arg5[%c0_10, %c0_11] : memref<768x256xbf16, #tpu.memory_space<vmem>>, vector<768x256xbf16>
      %17 = arith.extf %16 : vector<768x256xbf16> to vector<768x256xf32>
      %cst_12 = arith.constant dense<0.000000e+00> : vector<8x256xf32>
      %18 = tpu.matmul %15, %17, %cst_12 {dimension_numbers = #tpu.dot_dimension_numbers<[1], [0], [0], [1], [0, 0, 1, 1], [], []>} : vector<8x768xf32>, vector<768x256xf32>, vector<8x256xf32> -> vector<8x256xf32>
      %c0_13 = arith.constant 0 : index
      %c0_14 = arith.constant 0 : index
      %19 = vector.load %arg6[%c0_13, %c0_14] : memref<1x256xf32, #tpu.memory_space<vmem>>, vector<1x256xf32>
      %20 = vector.broadcast %19 : vector<1x256xf32> to vector<8x256xf32>
      %21 = arith.addf %18, %20 : vector<8x256xf32>
      %22 = arith.mulf %21, %21 : vector<8x256xf32>
      %cst_15 = arith.constant dense<0.000000e+00> : vector<8xf32>
      %23 = vector.multi_reduction <add>, %22, %cst_15 [1] : vector<8x256xf32> to vector<8xf32>
      %24 = vector.shape_cast %23 : vector<8xf32> to vector<8x1xf32>
      %cst_16 = arith.constant 1.000000e-24 : f32
      %25 = vector.broadcast %cst_16 : f32 to vector<8x1xf32>
      %26 = arith.cmpf ogt, %24, %25 : vector<8x1xf32>
      %cst_17 = arith.constant 1.000000e-24 : f32
      %27 = vector.broadcast %cst_17 : f32 to vector<8x1xf32>
      %28 = arith.maximumf %24, %27 : vector<8x1xf32>
      %29 = math.rsqrt %28 : vector<8x1xf32>
      %cst_18 = arith.constant 9.99999995E+11 : f32
      %30 = vector.broadcast %cst_18 : f32 to vector<8x1xf32>
      %31 = arith.select %26, %29, %30 : vector<8x1xi1>, vector<8x1xf32>
      %32 = vector.broadcast %31 : vector<8x1xf32> to vector<8x256xf32>
      %33 = arith.mulf %21, %32 : vector<8x256xf32>
      %c0_19 = arith.constant 0 : index
      %c0_20 = arith.constant 0 : index
      %c0_21 = arith.constant 0 : index
      %34 = vector.load %arg9[%c0_19, %c0_20, %c0_21] : memref<1x8x256xf32, #tpu.memory_space<vmem>>, vector<1x8x256xf32>
      %35 = vector.shape_cast %34 : vector<1x8x256xf32> to vector<8x256xf32>
      %36 = vector.shape_cast %33 : vector<8x256xf32> to vector<1x8x256xf32>
      tpu.vector_store %arg9[%c0_19, %c0_20, %c0_21], %36 {strides = array<i32>} : memref<1x8x256xf32, #tpu.memory_space<vmem>>, vector<1x8x256xf32>,
    } else {
    }
    %c1_i32 = arith.constant 1 : i32
    %3 = arith.cmpi eq, %arg0, %c1_i32 : i32
    %4 = arith.extui %3 : i1 to i32
    %c0_i32_1 = arith.constant 0 : i32
    %5 = arith.cmpi ne, %4, %c0_i32_1 : i32
    scf.if %5 {
      %c0 = arith.constant 0 : index
      %c0_2 = arith.constant 0 : index
      %6 = vector.load %arg2[%c0, %c0_2] : memref<8x512xf32, #tpu.memory_space<vmem>>, vector<8x512xf32>
      %c0_3 = arith.constant 0 : index
      %c0_4 = arith.constant 0 : index
      %7 = vector.load %arg7[%c0_3, %c0_4] : memref<512x256xbf16, #tpu.memory_space<vmem>>, vector<512x256xbf16>
      %8 = arith.extf %7 : vector<512x256xbf16> to vector<512x256xf32>
      %cst = arith.constant dense<0.000000e+00> : vector<8x256xf32>
      %9 = tpu.matmul %6, %8, %cst {dimension_numbers = #tpu.dot_dimension_numbers<[1], [0], [0], [1], [0, 0, 1, 1], [], []>} : vector<8x512xf32>, vector<512x256xf32>, vector<8x256xf32> -> vector<8x256xf32>
      %c0_5 = arith.constant 0 : index
      %c0_6 = arith.constant 0 : index
      %10 = vector.load %arg8[%c0_5, %c0_6] : memref<1x256xf32, #tpu.memory_space<vmem>>, vector<1x256xf32>
      %11 = vector.broadcast %10 : vector<1x256xf32> to vector<8x256xf32>
      %12 = arith.addf %9, %11 : vector<8x256xf32>
      %13 = arith.mulf %12, %12 : vector<8x256xf32>
      %cst_7 = arith.constant dense<0.000000e+00> : vector<8xf32>
      %14 = vector.multi_reduction <add>, %13, %cst_7 [1] : vector<8x256xf32> to vector<8xf32>
      %15 = vector.shape_cast %14 : vector<8xf32> to vector<8x1xf32>
      %cst_8 = arith.constant 1.000000e-24 : f32
      %16 = vector.broadcast %cst_8 : f32 to vector<8x1xf32>
      %17 = arith.cmpf ogt, %15, %16 : vector<8x1xf32>
      %cst_9 = arith.constant 1.000000e-24 : f32
      %18 = vector.broadcast %cst_9 : f32 to vector<8x1xf32>
      %19 = arith.maximumf %15, %18 : vector<8x1xf32>
      %20 = math.rsqrt %19 : vector<8x1xf32>
      %cst_10 = arith.constant 9.99999995E+11 : f32
      %21 = vector.broadcast %cst_10 : f32 to vector<8x1xf32>
      %22 = arith.select %17, %20, %21 : vector<8x1xi1>, vector<8x1xf32>
      %23 = vector.broadcast %22 : vector<8x1xf32> to vector<8x256xf32>
      %24 = arith.mulf %12, %23 : vector<8x256xf32>
      %c0_11 = arith.constant 0 : index
      %c0_12 = arith.constant 0 : index
      %c0_13 = arith.constant 0 : index
      %25 = vector.load %arg9[%c0_11, %c0_12, %c0_13] : memref<1x8x256xf32, #tpu.memory_space<vmem>>, vector<1x8x256xf32>
      %26 = vector.shape_cast %25 : vector<1x8x256xf32> to vector<8x256xf32>
      %27 = vector.shape_cast %24 : vector<8x256xf32> to vector<1x8x256xf32>
      tpu.vector_store %arg9[%c0_11, %c0_12, %c0_13], %27 {strides = array<i32>} : memref<1x8x256xf32, #tpu.memory_space<vmem>>, vector<1x8x256xf32>,
    } else {
    }
    return
  }
  func.func @transform_0(%arg0: i32) -> (i32, i32, i32) {
    %c0_i32 = arith.constant 0 : i32
    %c0_i32_0 = arith.constant 0 : i32
    %c0_i32_1 = arith.constant 0 : i32
    %c0_i32_2 = arith.constant 0 : i32
    return %c0_i32, %c0_i32_0, %c0_i32_1 : i32, i32, i32
  }
  func.func @transform_1(%arg0: i32) -> (i32, i32) {
    %c0_i32 = arith.constant 0 : i32
    %c0_i32_0 = arith.constant 0 : i32
    %c0_i32_1 = arith.constant 0 : i32
    return %c0_i32, %c0_i32_0 : i32, i32
  }
  func.func @transform_2(%arg0: i32) -> (i32, i32) {
    %c0_i32 = arith.constant 0 : i32
    %c0_i32_0 = arith.constant 0 : i32
    %c0_i32_1 = arith.constant 0 : i32
    return %c0_i32, %c0_i32_0 : i32, i32
  }
  func.func @transform_3(%arg0: i32) -> (i32, i32) {
    %c0_i32 = arith.constant 0 : i32
    %c0_i32_0 = arith.constant 0 : i32
    %c0_i32_1 = arith.constant 0 : i32
    return %c0_i32, %c0_i32_0 : i32, i32
  }
  func.func @transform_4(%arg0: i32) -> (i32, i32) {
    %c0_i32 = arith.constant 0 : i32
    %c0_i32_0 = arith.constant 0 : i32
    %c0_i32_1 = arith.constant 0 : i32
    return %c0_i32, %c0_i32_0 : i32, i32
  }
  func.func @transform_5(%arg0: i32) -> (i32, i32) {
    %c0_i32 = arith.constant 0 : i32
    %c0_i32_0 = arith.constant 0 : i32
    %c0_i32_1 = arith.constant 0 : i32
    return %c0_i32, %c0_i32_0 : i32, i32
  }
  func.func @transform_6(%arg0: i32) -> (i32, i32) {
    %c0_i32 = arith.constant 0 : i32
    %c0_i32_0 = arith.constant 0 : i32
    %c0_i32_1 = arith.constant 0 : i32
    return %c0_i32, %c0_i32_0 : i32, i32
  }
  func.func @transform_7(%arg0: i32) -> (i32, i32) {
    %c0_i32 = arith.constant 0 : i32
    %c0_i32_0 = arith.constant 0 : i32
    %c0_i32_1 = arith.constant 0 : i32
    return %c0_i32, %c0_i32_0 : i32, i32
  }
  func.func @transform_8(%arg0: i32) -> (i32, i32, i32) {
    %c0_i32 = arith.constant 0 : i32
    %c0_i32_0 = arith.constant 0 : i32
    %c0_i32_1 = arith.constant 0 : i32
    return %arg0, %c0_i32, %c0_i32_0 : i32, i32, i32
  }
}

</mosaic_0001>

<bundles_post_ra>
// kernel: tpu_custom_call.1
= control target key start
LH: loop header
LB: loop body
LE: loop exit
PB: predicated region body
PF: predicated region fallthrough
CT: control target
= control target key end

     0   :  { %13 = vsyncpa [#allocation3], 0  ;;  %s3472_s0 = inlined_call_operand.vmem [shape: f32[8,64,16], index: 0, kind: input, shape index: {}]   ;;  %s3473_s1 = inlined_call_operand.vmem [shape: f32[8,512], index: 1, kind: input, shape index: {}]   ;;  %s3474_s2 = inlined_call_operand.hbm [shape: bf16[64,768], index: 2, kind: input, shape index: {}]   ;;  %s3475_s3 = inlined_call_operand.vmem [shape: f32[1,768], index: 3, kind: input, shape index: {}]   ;;  %s3476_s4 = inlined_call_operand.hbm [shape: bf16[768,256], index: 4, kind: input, shape index: {}]   ;;  %s3477_s5 = inlined_call_operand.vmem [shape: f32[1,256], index: 5, kind: input, shape index: {}]   ;;  %s3478_s6 = inlined_call_operand.vmem [shape: bf16[512,256], index: 6, kind: input, shape index: {}]   ;;  %s3479_s7 = inlined_call_operand.vmem [shape: f32[1,256], index: 7, kind: input, shape index: {}]   ;;  %s3480_s8 = inlined_call_operand.hbm [shape: f32[2,8,256], index: 8, kind: output, shape index: {}]  }
   0x1   :  { %14 = vsyncpa [#allocation6], 0 }
   0x2   :  { %15 = vsyncpa [#allocation4], 0 }
   0x3   :  { %17 = vsyncpa [#allocation4 + $0x1], 0  ;;  %s2605_s27 = smov 0   ;;  %s2607_s28 = smov 0  }
   0x4   :  { %s2609_s29 = smov 0   ;;  %s2611_s30 = smov 0  }
   0x5 LB: > { %s2626_s9 = sadd.s32 4294967295, %s2550_s30   ;;  %s2342_s10 = sadd.s32 4294967294, %s2550_s30   ;;  %s2550_s30 = sphi %s2611_s30, %s3495_s30   ;;  %s2546_s29 = sphi %s2609_s29, %s3494_s29   ;;  %s2542_s28 = sphi %s2607_s28, %s3493_s28   ;;  %s2538_s27 = sphi %s2605_s27, %s3492_s27  }
   0x6   : > { %s2630_s11 = sadd.s32 1, %s2550_s30   ;;  %s198_s12 = sadd.s32 1, %s2546_s29 }
   0x7   : > { %s195_s13 = ssub.s32 %s2550_s30, %s2630_s11  ;;  %p208_p0 = scmp.ne.s32.totalorder %s2546_s29, %s2542_s28 }
   0x8   : > { %p196_p1 = scmp.eq.s32.totalorder %s195_s13, 0  ;;  %p209_p2 = scmp.eq.s32.totalorder %s2626_s9, 1 }
   0x9   : > { %p214_p3 = scmp.ne.s32.totalorder %s2542_s28, %s2538_s27  ;;  %p215_p4 = scmp.eq.s32.totalorder %s2342_s10, 1 }
   0xa   : > { %s2641_s14 = scalar_select %p196_p1, %s2546_s29, %s198_s12  }
   0xb   : > { %p2643_p5 = por %p209_p2, %p208_p0  ;;  %p2647_p6 = por %p215_p4, %p214_p3 }
   0xc   : > { %p2343_p7 = scmp.ge.s32.totalorder %s2550_s30, 1  ;;  %p222_p8 = scmp.lt.s32.totalorder %s2550_s30, 3 }
   0xd   : > { %s3483_s16 = scalar_select %p2647_p6, 1, 0 }
   0xe   : > { %p3481_p10 = scmp.eq.s32.totalorder %s2626_s9, 0  ;;  %p2655_p11 = pnand %p2343_p7, %p222_p8 }
   0xf   : > { %s2552_s18 = smov [#allocation2]   ;;  %s2553_s21 = smov [#allocation5]  }
  0x10   : > { %s240_s19 = sshll.u32 %s2552_s18, 4  ;;  %p2371_p12 = pneg %p2655_p11  ;;  %s241_s19 = int_to_ptr.vmem [resolvable:$true] %s240_s19 }
  0x11   : > { %s256_s22 = sshll.u32 %s2553_s21, 4  ;;  %s2441_s23 = scalar_lea.vmem %s241_s19, 3072  ;;  %s257_s22 = int_to_ptr.vmem [resolvable:$true] %s256_s22 }
  0x12   : > { %p2663_p13 = pnand %p3481_p10, %p2371_p12  ;;  %p2442_p1 = scmp.ne.s32.totalorder %s241_s19, %s2441_s23 }
  0x13   : > { %p2449_p4 = scmp.lt.s32.totalorder %s241_s19, %s241_s19  ;;  %p2450_p7 = scmp.lt.s32.totalorder %s2441_s23, %s2441_s23 }
  0x14   : > { %p2432_p0 = pneg %p2663_p13 }
  0x15   : > { %p2451_p8 = por %p2450_p7, %p2449_p4 }
  0x16   : > { %p2444_p2 = pnand %p2442_p1, %p2432_p0 }
  0x18   : > { %p2445_p3 = pneg %p2444_p2 }
  0x1a   : > { %p2452_p12 = pnand %p2451_p8, %p2445_p3 }
  0x1c   : > { %2455 = shalt.err (!%p2452_p12)
}
  0x1d   : > { %s2554_s24 = smov 384   ;;  %s2555_s25 = smov 24  }
  0x1e   : > { %2374 = dma.hbm_to_vmem [thread:$0]  (!%p2663_p13), %s3474_s2, 3072, %s241_s19, [#allocation3], %s2554_s24, %s2554_s24, %s2555_s25  }
  0x1f   : > { %s2467_s12 = scalar_lea.vmem %s257_s22, 12288  ;;  %p2475_p10 = scmp.lt.s32.totalorder %s257_s22, %s257_s22 }
  0x20   : > { %p2468_p9 = scmp.ne.s32.totalorder %s257_s22, %s2467_s12  ;;  %p2476_p6 = scmp.lt.s32.totalorder %s2467_s12, %s2467_s12 }
  0x22   : > { %p2470_p1 = pnand %p2468_p9, %p2432_p0  ;;  %p2477_p4 = por %p2476_p6, %p2475_p10 }
  0x24   : > { %p2471_p2 = pneg %p2470_p1 }
  0x26   : > { %p2478_p3 = pnand %p2477_p4, %p2471_p2 }
  0x28   : > { %2481 = shalt.err (!%p2478_p3)
}
  0x29   : > { %s2556_s13 = smov 128   ;;  %s2557_s18 = smov 8  }
  0x2a   : > { %2377 = dma.hbm_to_vmem [thread:$0]  (!%p2663_p13), %s3476_s4, 12288, %s257_s22, [#allocation6], %s2556_s13, %s2556_s13, %s2557_s18  }
  0x2b   : > { %281 = sbr.rel (%p2655_p11) target bundleno = 1411 (0x583), region = 52  ;;  %p3486_p7 = scmp.eq.s32.totalorder (!%p2655_p11), %s2626_s9, 0 }
  0x30   : > { %2525 = dma.done.wait (%p3486_p7), [#allocation3], 3072   ;;  %p3487_p9 = pmov %p3486_p7 }
  0x31   : > { %p3488_p6 = pmov %p3486_p7 }
  0x32   : > { %2527 = vsyncadd (%p3487_p9), [#allocation3], 4294964224 }
  0x33   : > { %2529 = dma.done.wait (%p3488_p6), [#allocation6], 12288   ;;  %p3489_p10 = pmov %p3488_p6 }
  0x34   : > { %s311_s19 = sand.u32 1, %s2542_s28   ;;  %p3490_p11 = scmp.ne.s32.totalorder %s2626_s9, 0 }
  0x35   : > { %2531 = vsyncadd (%p3489_p10), [#allocation6], 4294955008  ;;  %s2349_s20 = sshll.u32 %s311_s19, 4 }
  0x36   : > { %s2698_s22 = scalar_lea.vmem [#allocation7], %s2349_s20  ;;  %317 = sbr.rel (%p3490_p11) target bundleno = 952 (0x3b8), region = 64 }
  0x3b   : > { %v326_v0 = vld [vmem:[%s3472_s0 + $0x40] sm:$0xff]  ;;  %vm382_vm0 = vcmask 130048   ;;  %v327_v2 = vld [vmem:[%s3472_s0 + $0x48] sm:$0xff]  ;;  %v328_v8 = vld [vmem:[%s3472_s0 + $0x50] sm:$0xff]  ;;  %vm818_vm1 = vcmask 130112   ;;  %vm825_vm2 = vcmask 195712  }
  0x3c   : > { %v318_v1 = vld [vmem:[%s3472_s0] sm:$0xff]  ;;  %v407_v3 = vsel %vm382_vm0, %v326_v0, 0.0  ;;  %v319_v5 = vld [vmem:[%s3472_s0 + $0x8] sm:$0xff]  ;;  %v410_v6 = vsel %vm382_vm0, %v327_v2, 0.0  ;;  %v320_v9 = vld [vmem:[%s3472_s0 + $0x10] sm:$0xff]  ;;  %v413_v10 = vsel %vm382_vm0, %v328_v8, 0.0 }
  0x3d   : > { %v383_v4 = vsel %vm382_vm0, %v318_v1, 0.0  ;;  %408 = vadd.xlane.f32.xlu1 %v407_v3  ;;  %v386_v7 = vsel %vm382_vm0, %v319_v5, 0.0  ;;  %v389_v11 = vsel %vm382_vm0, %v320_v9, 0.0  ;;  %v335_v12 = vld [vmem:[%s3472_s0 + $0x88] sm:$0xff]  ;;  %v334_v13 = vld [vmem:[%s3472_s0 + $0x80] sm:$0xff]  ;;  %v329_v16 = vld [vmem:[%s3472_s0 + $0x58] sm:$0xff] }
  0x3e   : > { %384 = vadd.xlane.f32.xlu0 %v383_v4  ;;  %v434_v14 = vsel %vm382_vm0, %v335_v12, 0.0  ;;  %v431_v15 = vsel %vm382_vm0, %v334_v13, 0.0  ;;  %v321_v17 = vld [vmem:[%s3472_s0 + $0x18] sm:$0xff]  ;;  %v416_v18 = vsel %vm382_vm0, %v329_v16, 0.0  ;;  %v342_v20 = vld [vmem:[%s3472_s0 + $0xc0] sm:$0xff]  ;;  %v336_v21 = vld [vmem:[%s3472_s0 + $0x90] sm:$0xff] }
  0x3f   : > { %v392_v19 = vsel %vm382_vm0, %v321_v17, 0.0  ;;  %v455_v22 = vsel %vm382_vm0, %v342_v20, 0.0  ;;  %v437_v23 = vsel %vm382_vm0, %v336_v21, 0.0  ;;  %v322_v24 = vld [vmem:[%s3472_s0 + $0x20] sm:$0xff]  ;;  %v343_v25 = vld [vmem:[%s3472_s0 + $0xc8] sm:$0xff]  ;;  %v337_v28 = vld [vmem:[%s3472_s0 + $0x98] sm:$0xff] }
  0x40   : > { %v395_v26 = vsel %vm382_vm0, %v322_v24, 0.0  ;;  %v458_v27 = vsel %vm382_vm0, %v343_v25, 0.0  ;;  %v330_v29 = vld [vmem:[%s3472_s0 + $0x60] sm:$0xff]  ;;  %v440_v30 = vsel %vm382_vm0, %v337_v28, 0.0  ;;  %v344_v33 = vld [vmem:[%s3472_s0 + $0xd0] sm:$0xff]  ;;  %v323_v36 = vld [vmem:[%s3472_s0 + $0x28] sm:$0xff] }
  0x41   : > { %411 = vadd.xlane.f32.xlu1 %v410_v6  ;;  %v419_v31 = vsel %vm382_vm0, %v330_v29, 0.0  ;;  %v350_v32 = vld [vmem:[%s3472_s0 + $0x100] sm:$0xff]  ;;  %v461_v35 = vsel %vm382_vm0, %v344_v33, 0.0  ;;  %v351_v37 = vld [vmem:[%s3472_s0 + $0x108] sm:$0xff]  ;;  %v398_v38 = vsel %vm382_vm0, %v323_v36, 0.0  ;;  %v352_v44 = vld [vmem:[%s3472_s0 + $0x110] sm:$0xff] }
  0x42   : > { %387 = vadd.xlane.f32.xlu0 %v386_v7  ;;  %v479_v34 = vsel %vm382_vm0, %v350_v32, 0.0  ;;  %v482_v39 = vsel %vm382_vm0, %v351_v37, 0.0  ;;  %v338_v40 = vld [vmem:[%s3472_s0 + $0xa0] sm:$0xff]  ;;  %v331_v41 = vld [vmem:[%s3472_s0 + $0x68] sm:$0xff]  ;;  %v345_v45 = vld [vmem:[%s3472_s0 + $0xd8] sm:$0xff]  ;;  %v485_v46 = vsel %vm382_vm0, %v352_v44, 0.0 }
  0x43   : > { %v443_v42 = vsel %vm382_vm0, %v338_v40, 0.0  ;;  %v422_v43 = vsel %vm382_vm0, %v331_v41, 0.0  ;;  %v464_v47 = vsel %vm382_vm0, %v345_v45, 0.0  ;;  %v359_v48 = vld [vmem:[%s3472_s0 + $0x148] sm:$0xff]  ;;  %v358_v49 = vld [vmem:[%s3472_s0 + $0x140] sm:$0xff]  ;;  %v332_v52 = vld [vmem:[%s3472_s0 + $0x70] sm:$0xff] }
  0x44   : > { %v506_v50 = vsel %vm382_vm0, %v359_v48, 0.0  ;;  %v503_v51 = vsel %vm382_vm0, %v358_v49, 0.0  ;;  %v324_v53 = vld [vmem:[%s3472_s0 + $0x30] sm:$0xff]  ;;  %v425_v54 = vsel %vm382_vm0, %v332_v52, 0.0  ;;  %v346_v56 = vld [vmem:[%s3472_s0 + $0xe0] sm:$0xff]  ;;  %v339_v57 = vld [vmem:[%s3472_s0 + $0xa8] sm:$0xff] }
  0x45   : > { %414 = vadd.xlane.f32.xlu1 %v413_v10  ;;  %v401_v55 = vsel %vm382_vm0, %v324_v53, 0.0  ;;  %v467_v58 = vsel %vm382_vm0, %v346_v56, 0.0  ;;  %v446_v59 = vsel %vm382_vm0, %v339_v57, 0.0  ;;  %v360_v60 = vld [vmem:[%s3472_s0 + $0x150] sm:$0xff]  ;;  %v353_v61 = vld [vmem:[%s3472_s0 + $0x118] sm:$0xff]  ;;  %v367_v0 = vld [vmem:[%s3472_s0 + $0x188] sm:$0xff] }
  0x46   : > { %390 = vadd.xlane.f32.xlu0 %v389_v11  ;;  %v509_v62 = vsel %vm382_vm0, %v360_v60, 0.0  ;;  %v488_v63 = vsel %vm382_vm0, %v353_v61, 0.0  ;;  %v366_v1 = vld [vmem:[%s3472_s0 + $0x180] sm:$0xff]  ;;  %v530_v2 = vsel %vm382_vm0, %v367_v0, 0.0  ;;  %v333_v4 = vld [vmem:[%s3472_s0 + $0x78] sm:$0xff]  ;;  %v347_v8 = vld [vmem:[%s3472_s0 + $0xe8] sm:$0xff] }
  0x47   : > { %v527_v3 = vsel %vm382_vm0, %v366_v1, 0.0  ;;  %v325_v5 = vld [vmem:[%s3472_s0 + $0x38] sm:$0xff]  ;;  %v428_v6 = vsel %vm382_vm0, %v333_v4, 0.0  ;;  %v340_v9 = vld [vmem:[%s3472_s0 + $0xb0] sm:$0xff]  ;;  %v470_v10 = vsel %vm382_vm0, %v347_v8, 0.0  ;;  %v354_v13 = vld [vmem:[%s3472_s0 + $0x120] sm:$0xff] }
  0x48   : > { %v404_v7 = vsel %vm382_vm0, %v325_v5, 0.0  ;;  %v449_v11 = vsel %vm382_vm0, %v340_v9, 0.0  ;;  %v361_v12 = vld [vmem:[%s3472_s0 + $0x158] sm:$0xff]  ;;  %v374_v16 = vld [vmem:[%s3472_s0 + $0x1c0] sm:$0xff]  ;;  %v368_v17 = vld [vmem:[%s3472_s0 + $0x190] sm:$0xff]  ;;  %vm832_vm3 = vcmask 261312  }
  0x49   : > { %435 = vadd.xlane.f32.xlu1 %v434_v14  ;;  %v512_v14 = vsel %vm382_vm0, %v361_v12, 0.0  ;;  %v341_v20 = vld [vmem:[%s3472_s0 + $0xb8] sm:$0xff]  ;;  %v375_v21 = vld [vmem:[%s3472_s0 + $0x1c8] sm:$0xff]  ;;  %v348_v25 = vld [vmem:[%s3472_s0 + $0xf0] sm:$0xff]  ;;  %vm839_vm4 = vcmask 326912   ;;  %vm846_vm5 = vcmask 392512  }
  0x4a   : > { %432 = vadd.xlane.f32.xlu0 %v431_v15  ;;  %v491_v15 = vsel %vm382_vm0, %v354_v13, 0.0  ;;  %v355_v24 = vld [vmem:[%s3472_s0 + $0x128] sm:$0xff]  ;;  %v369_v28 = vld [vmem:[%s3472_s0 + $0x198] sm:$0xff]  ;;  %v362_v29 = vld [vmem:[%s3472_s0 + $0x160] sm:$0xff]  ;;  %v713_v13 = vlaneseq  ;;  %vm853_vm6 = vcmask 458112   ;;  %vm860_vm7 = vcmask 523712  }
  0x4b   : > { %v349_v32 = vld [vmem:[%s3472_s0 + $0xf8] sm:$0xff]  ;;  %v376_v33 = vld [vmem:[%s3472_s0 + $0x1d0] sm:$0xff]  ;;  %v363_v36 = vld [vmem:[%s3472_s0 + $0x168] sm:$0xff]  ;;  %vm1135_vm8 = vcmask 1041409   ;;  %vm1137_vm9 = vcmask 1042434   ;;  %vm1139_vm10 = vcmask 1043459  }
  0x4c   : > { %v356_v37 = vld [vmem:[%s3472_s0 + $0x130] sm:$0xff]  ;;  %v377_v40 = vld [vmem:[%s3472_s0 + $0x1d8] sm:$0xff]  ;;  %v370_v41 = vld [vmem:[%s3472_s0 + $0x1a0] sm:$0xff]  ;;  %vm1141_vm11 = vcmask 1044484   ;;  %vm1143_vm12 = vcmask 1045509   ;;  %vm1145_vm13 = vcmask 1046534  }
  0x4d   : > { %417 = vadd.xlane.f32.xlu1 %v416_v18  ;;  %v551_v18 = vsel %vm382_vm0, %v374_v16, 0.0  ;;  %v364_v44 = vld [vmem:[%s3472_s0 + $0x170] sm:$0xff]  ;;  %v357_v45 = vld [vmem:[%s3472_s0 + $0x138] sm:$0xff]  ;;  %v378_v48 = vld [vmem:[%s3472_s0 + $0x1e0] sm:$0xff]  ;;  %vm1147_vm14 = vcmask 1047559   ;;  %vm1149_vm15 = vcmask 523264  }
  0x4e   : > { %393 = vadd.xlane.f32.xlu0 %v392_v19  ;;  %v533_v19 = vsel %vm382_vm0, %v368_v17, 0.0  ;;  %v371_v49 = vld [vmem:[%s3472_s0 + $0x1a8] sm:$0xff]  ;;  %v372_v52 = vld [vmem:[%s3472_s0 + $0x1b0] sm:$0xff]  ;;  %v365_v53 = vld [vmem:[%s3472_s0 + $0x178] sm:$0xff] }
  0x4f   : > { %v373_v56 = vld [vmem:[%s3472_s0 + $0x1b8] sm:$0xff]  ;;  %v379_v57 = vld [vmem:[%s3472_s0 + $0x1e8] sm:$0xff]  ;;  %v380_v60 = vld [vmem:[%s3472_s0 + $0x1f0] sm:$0xff] }
  0x50   : > { %v381_v61 = vld [vmem:[%s3472_s0 + $0x1f8] sm:$0xff]  ;;  %v660_v0 = vld [vmem:[#allocation2 + $0xa8] sm:$0xff]  ;;  %v651_v9 = vld [vmem:[#allocation2 + $0x60] sm:$0xff] }
  0x51   : > { %456 = vadd.xlane.f32.xlu1 %v455_v22  ;;  %v452_v22 = vsel %vm382_vm0, %v341_v20, 0.0  ;;  %v706_v1 = vunpack.c.h.bf16 %v660_v0  ;;  %v648_v12 = vld [vmem:[#allocation2 + $0x48] sm:$0xff]  ;;  %v645_v16 = vld [vmem:[#allocation2 + $0x30] sm:$0xff]  ;;  %v2958_v20 = vand.u32 127, %v713_v13 }
  0x52   : > { %438 = vadd.xlane.f32.xlu0 %v437_v23  ;;  %v554_v23 = vsel %vm382_vm0, %v375_v21, 0.0  ;;  %v676_v17 = vunpack.c.h.bf16 %v645_v16 }
  0x53   : > { %1168 = vmatprep.subr.mxu0 %v706_v1 }
  0x55   : > { %396 = vadd.xlane.f32.xlu1 %v395_v26  ;;  %v494_v26 = vsel %vm382_vm0, %v355_v24, 0.0  ;;  %v2960_v24 = vshrl.u32 %v713_v13, 7 }
  0x56   : > { %459 = vadd.xlane.f32.xlu0 %v458_v27  ;;  %v473_v27 = vsel %vm382_vm0, %v348_v25, 0.0  ;;  %v813_v25 = vadd.s32 4294967288, %v2958_v20 }
  0x59   : > { %441 = vadd.xlane.f32.xlu1 %v440_v30  ;;  %v536_v30 = vsel %vm382_vm0, %v369_v28, 0.0 }
  0x5a   : > { %420 = vadd.xlane.f32.xlu0 %v419_v31  ;;  %v515_v31 = vsel %vm382_vm0, %v362_v29, 0.0 }
  0x5d   : > { %480 = vadd.xlane.f32.xlu1 %v479_v34  ;;  %v476_v34 = vsel %vm382_vm0, %v349_v32, 0.0  ;;  %v2558_v32 = vmov 0.0  }
  0x5e   : > { %462 = vadd.xlane.f32.xlu0 %v461_v35  ;;  %v557_v35 = vsel %vm382_vm0, %v376_v33, 0.0  ;;  %1216 = vmatprep.mubr.f32.mxu0 %v2558_v32 }
  0x61   : > { %399 = vadd.xlane.f32.xlu1 %v398_v38  ;;  %v518_v38 = vsel %vm382_vm0, %v363_v36, 0.0 }
  0x62   : > { %483 = vadd.xlane.f32.xlu0 %v482_v39  ;;  %v497_v39 = vsel %vm382_vm0, %v356_v37, 0.0  ;;  %v2973_v37 = vsub.s32 %v813_v25, %v2960_v24 }
  0x65   : > { %444 = vadd.xlane.f32.xlu1 %v443_v42  ;;  %v560_v42 = vsel %vm382_vm0, %v377_v40, 0.0 }
  0x66   : > { %423 = vadd.xlane.f32.xlu0 %v422_v43  ;;  %v539_v43 = vsel %vm382_vm0, %v370_v41, 0.0 }
  0x69   : > { %486 = vadd.xlane.f32.xlu1 %v485_v46  ;;  %v521_v46 = vsel %vm382_vm0, %v364_v44, 0.0 }
  0x6a   : > { %465 = vadd.xlane.f32.xlu0 %v464_v47  ;;  %v500_v47 = vsel %vm382_vm0, %v357_v45, 0.0 }
  0x6d   : > { %507 = vadd.xlane.f32.xlu1 %v506_v50  ;;  %v563_v50 = vsel %vm382_vm0, %v378_v48, 0.0 }
  0x6e   : > { %504 = vadd.xlane.f32.xlu0 %v503_v51  ;;  %v542_v51 = vsel %vm382_vm0, %v371_v49, 0.0 }
  0x71   : > { %426 = vadd.xlane.f32.xlu1 %v425_v54  ;;  %v545_v54 = vsel %vm382_vm0, %v372_v52, 0.0 }
  0x72   : > { %402 = vadd.xlane.f32.xlu0 %v401_v55  ;;  %v524_v55 = vsel %vm382_vm0, %v365_v53, 0.0 }
  0x75   : > { %468 = vadd.xlane.f32.xlu1 %v467_v58  ;;  %v548_v58 = vsel %vm382_vm0, %v373_v56, 0.0 }
  0x76   : > { %447 = vadd.xlane.f32.xlu0 %v446_v59  ;;  %v566_v59 = vsel %vm382_vm0, %v379_v57, 0.0 }
  0x79   : > { %510 = vadd.xlane.f32.xlu1 %v509_v62  ;;  %v569_v62 = vsel %vm382_vm0, %v380_v60, 0.0 }
  0x7a   : > { %489 = vadd.xlane.f32.xlu0 %v488_v63  ;;  %v572_v63 = vsel %vm382_vm0, %v381_v61, 0.0 }
  0x7d   : > { %531 = vadd.xlane.f32.xlu1 %v530_v2  ;;  %v705_v2 = vunpack.c.l.bf16 %v660_v0 }
  0x7e   : > { %528 = vadd.xlane.f32.xlu0 %v527_v3  ;;  %v657_v3 = vld [vmem:[#allocation2 + $0x90] sm:$0xff] }
  0x7f   : > { %v700_v4 = vunpack.c.h.bf16 %v657_v3  ;;  %v699_v5 = vunpack.c.l.bf16 %v657_v3  ;;  %1169 = vmatpush1.msra.mxu0 %v705_v2 }
  0x81   : > { %429 = vadd.xlane.f32.xlu1 %v428_v6  ;;  %v654_v6 = vld [vmem:[#allocation2 + $0x78] sm:$0xff]  ;;  %1170 = vmatprep.subr.mxu0 %v700_v4 }
  0x82   : > { %405 = vadd.xlane.f32.xlu0 %v404_v7  ;;  %v694_v7 = vunpack.c.h.bf16 %v654_v6  ;;  %v693_v8 = vunpack.c.l.bf16 %v654_v6  ;;  %1171 = vmatpush1.msra.mxu0 %v699_v5 }
  0x84   : > { %1172 = vmatprep.subr.mxu0 %v694_v7 }
  0x85   : > { %471 = vadd.xlane.f32.xlu1 %v470_v10  ;;  %v688_v10 = vunpack.c.h.bf16 %v651_v9  ;;  %1173 = vmatpush1.msra.mxu0 %v693_v8  ;;  %v834_v8 = vadd.s32 4294967264, %v2958_v20 }
  0x86   : > { %450 = vadd.xlane.f32.xlu0 %v449_v11  ;;  %v687_v11 = vunpack.c.l.bf16 %v651_v9 }
  0x87   : > { %1174 = vmatprep.subr.mxu0 %v688_v10 }
  0x88   : > { %1175 = vmatpush1.msra.mxu0 %v687_v11 }
  0x89   : > { %513 = vadd.xlane.f32.xlu1 %v512_v14  ;;  %v682_v14 = vunpack.c.h.bf16 %v648_v12 }
  0x8a   : > { %492 = vadd.xlane.f32.xlu0 %v491_v15  ;;  %v681_v15 = vunpack.c.l.bf16 %v648_v12 }
  0x8b   : > { %1176 = vmatprep.subr.mxu0 %v682_v14 }
  0x8c   : > { %1177 = vmatpush1.msra.mxu0 %v681_v15 }
  0x8d   : > { %552 = vadd.xlane.f32.xlu1 %v551_v18  ;;  %v675_v18 = vunpack.c.l.bf16 %v645_v16  ;;  %1178 = vmatprep.subr.mxu0 %v676_v17  ;;  %v3002_v16 = vsub.s32 %v834_v8, %v2960_v24 }
  0x8e   : > { %534 = vadd.xlane.f32.xlu0 %v533_v19  ;;  %v642_v19 = vld [vmem:[#allocation2 + $0x18] sm:$0xff] }
  0x8f   : > { %v670_v21 = vunpack.c.h.bf16 %v642_v19  ;;  %1179 = vmatpush1.msra.mxu0 %v675_v18 }
  0x91   : > { %453 = vadd.xlane.f32.xlu1 %v452_v22  ;;  %v669_v22 = vunpack.c.l.bf16 %v642_v19  ;;  %1180 = vmatprep.subr.mxu0 %v670_v21 }
  0x92   : > { %555 = vadd.xlane.f32.xlu0 %v554_v23  ;;  %v639_v23 = vld [vmem:[#allocation2] sm:$0xff] }
  0x93   : > { %v663_v29 = vunpack.c.l.bf16 %v639_v23  ;;  %1181 = vmatpush1.msra.mxu0 %v669_v22 }
  0x95   : > { %495 = vadd.xlane.f32.xlu1 %v494_v26  ;;  %v664_v26 = vunpack.c.h.bf16 %v639_v23 }
  0x96   : > { %474 = vadd.xlane.f32.xlu0 %v473_v27 }
  0x97   : > { %1182 = vmatprep.subr.mxu0 %v664_v26 }
  0x98   : > { %1183 = vmatpush1.msra.mxu0 %v663_v29 }
  0x99   : > { %537 = vadd.xlane.f32.xlu1 %v536_v30  ;;  %v2963_v30 = vld [vmem:[#allocation2 + $0xb0] sm:$0xff] }
  0x9a   : > { %516 = vadd.xlane.f32.xlu0 %v515_v31  ;;  %v820_v31 = vadd.s32 4294967280, %v2958_v20  ;;  %v708_v33 = vunpack.c.h.bf16 %v2963_v30 }
  0x9c   : > { %1239 = vmatprep.subr.mxu0 %v708_v33 }
  0x9d   : > { %477 = vadd.xlane.f32.xlu1 %v476_v34  ;;  %v2970_v34 = vsub.s32 %v2958_v20, %v2960_v24 }
  0x9e   : > { %558 = vadd.xlane.f32.xlu0 %v557_v35 }
  0xa1   : > { %519 = vadd.xlane.f32.xlu1 %v518_v38 }
  0xa2   : > { %498 = vadd.xlane.f32.xlu0 %v497_v39 }
  0xa5   : > { %561 = vadd.xlane.f32.xlu1 %v560_v42  ;;  %v2976_v42 = vsub.s32 %v820_v31, %v2960_v24 }
  0xa6   : > { %540 = vadd.xlane.f32.xlu0 %v539_v43 }
  0xa9   : > { %522 = vadd.xlane.f32.xlu1 %v521_v46 }
  0xaa   : > { %501 = vadd.xlane.f32.xlu0 %v500_v47 }
  0xad   : > { %564 = vadd.xlane.f32.xlu1 %v563_v50 }
  0xae   : > { %543 = vadd.xlane.f32.xlu0 %v542_v51 }
  0xb1   : > { %546 = vadd.xlane.f32.xlu1 %v545_v54 }
  0xb2   : > { %525 = vadd.xlane.f32.xlu0 %v524_v55  ;;  %v827_v55 = vadd.s32 4294967272, %v2958_v20 }
  0xb4   : > { %v2992_v0 = vsub.s32 %v827_v55, %v2960_v24 }
  0xb5   : > { %549 = vadd.xlane.f32.xlu1 %v548_v58 }
  0xb6   : > { %567 = vadd.xlane.f32.xlu0 %v566_v59 }
  0xb9   : > { %573 = vadd.xlane.f32.xlu1 %v572_v63 }
  0xba   : > { %570 = vadd.xlane.f32.xlu0 %v569_v62 }
  0xc6   : > { %v409_v27 = vpop.xlane.xlu1 %408 }
  0xc7   : > { %v385_v28 = vpop.xlane.xlu0 %384  ;;  %v583_v35 = vmul.f32 0.0625, %v409_v27 }
  0xc8   : > { %v575_v36 = vmul.f32 0.0625, %v385_v28 }
  0xc9   : > { %v865_v43 = vrot.slane %v583_v35, %v2970_v34 }
  0xca   : > { %v412_v38 = vpop.xlane.xlu1 %411  ;;  %v812_v44 = vrot.slane %v575_v36, %v2970_v34 }
  0xcb   : > { %v388_v39 = vpop.xlane.xlu0 %387  ;;  %v584_v40 = vmul.f32 0.0625, %v412_v38 }
  0xcc   : > { %v576_v41 = vmul.f32 0.0625, %v388_v39  ;;  %v841_v39 = vadd.s32 4294967256, %v2958_v20 }
  0xcd   : > { %v869_v45 = vrot.slane %v584_v40, %v2973_v37 }
  0xce   : > { %v817_v46 = vrot.slane %v576_v41, %v2973_v37  ;;  %v415_v47 = vpop.xlane.xlu1 %414 }
  0xcf   : > { %v391_v48 = vpop.xlane.xlu0 %390  ;;  %v870_v49 = vsel %vm818_vm1, %v869_v45, %v865_v43  ;;  %v585_v51 = vmul.f32 0.0625, %v415_v47 }
  0xd0   : > { %v819_v50 = vsel %vm818_vm1, %v817_v46, %v812_v44  ;;  %v577_v52 = vmul.f32 0.0625, %v391_v48  ;;  %v3017_v48 = vsub.s32 %v841_v39, %v2960_v24 }
  0xd1   : > { %v874_v53 = vrot.slane %v585_v51, %v2976_v42  ;;  %v1380_v51 = vld [vmem:[#allocation5 + $0x78] sm:$0xff] }
  0xd2   : > { %v824_v54 = vrot.slane %v577_v52, %v2976_v42  ;;  %v436_v56 = vpop.xlane.xlu1 %435  ;;  %v1379_v52 = vld [vmem:[#allocation5 + $0x70] sm:$0xff] }
  0xd3   : > { %v433_v57 = vpop.xlane.xlu0 %432  ;;  %v875_v58 = vsel %vm825_vm2, %v874_v53, %v870_v49  ;;  %v592_v60 = vmul.f32 0.0625, %v436_v56  ;;  %v1378_v53 = vld [vmem:[#allocation5 + $0x68] sm:$0xff] }
  0xd4   : > { %v826_v59 = vsel %vm825_vm2, %v824_v54, %v819_v50  ;;  %v591_v61 = vmul.f32 0.0625, %v433_v57  ;;  %v1492_v57 = vunpack.c.h.bf16 %v1380_v51 }
  0xd5   : > { %v908_v62 = vrot.slane %v592_v60, %v2973_v37  ;;  %v1490_v60 = vunpack.c.h.bf16 %v1379_v52 }
  0xd6   : > { %v904_v63 = vrot.slane %v591_v61, %v2970_v34  ;;  %v418_v1 = vpop.xlane.xlu1 %417  ;;  %v1489_v61 = vunpack.c.l.bf16 %v1379_v52  ;;  %1665 = vmatprep.subr.mxu1 %v1492_v57 }
  0xd7   : > { %v394_v2 = vpop.xlane.xlu0 %393  ;;  %v586_v4 = vmul.f32 0.0625, %v418_v1 }
  0xd8   : > { %v909_v3 = vsel %vm818_vm1, %v908_v62, %v904_v63  ;;  %v578_v5 = vmul.f32 0.0625, %v394_v2  ;;  %v1488_v2 = vunpack.c.h.bf16 %v1378_v53 }
  0xd9   : > { %v879_v6 = vrot.slane %v586_v4, %v2992_v0 }
  0xda   : > { %v831_v7 = vrot.slane %v578_v5, %v2992_v0  ;;  %v457_v9 = vpop.xlane.xlu1 %456  ;;  %v1487_v5 = vunpack.c.l.bf16 %v1378_v53 }
  0xdb   : > { %v439_v10 = vpop.xlane.xlu0 %438  ;;  %v880_v11 = vsel %vm832_vm3, %v879_v6, %v875_v58  ;;  %v599_v14 = vmul.f32 0.0625, %v457_v9  ;;  %v1377_v58 = vld [vmem:[#allocation5 + $0x60] sm:$0xff] }
  0xdc   : > { %v833_v12 = vsel %vm832_vm3, %v831_v7, %v826_v59  ;;  %v593_v13 = vmul.f32 0.0625, %v439_v10  ;;  %v1491_v59 = vunpack.c.l.bf16 %v1380_v51  ;;  %v1486_v6 = vunpack.c.h.bf16 %v1377_v58  ;;  %v1376_v7 = vld [vmem:[#allocation5 + $0x58] sm:$0xff]  ;;  %v1371_v51 = vld [vmem:[#allocation5 + $0x30] sm:$0xff] }
  0xdd   : > { %v943_v23 = vrot.slane %v599_v14, %v2970_v34 }
  0xde   : > { %v913_v15 = vrot.slane %v593_v13, %v2976_v42  ;;  %v397_v17 = vpop.xlane.xlu1 %396  ;;  %1666 = vmatpush1.msra.mxu1 %v1491_v59  ;;  %v1485_v13 = vunpack.c.l.bf16 %v1377_v58  ;;  %v1370_v59 = vld [vmem:[#allocation5 + $0x28] sm:$0xff] }
  0xdf   : > { %v460_v18 = vpop.xlane.xlu0 %459  ;;  %v579_v21 = vmul.f32 0.0625, %v397_v17  ;;  %1667 = vmatprep.subr.mxu1 %v1490_v60  ;;  %v1484_v17 = vunpack.c.h.bf16 %v1376_v7 }
  0xe0   : > { %v914_v19 = vsel %vm825_vm2, %v913_v15, %v909_v3  ;;  %v600_v22 = vmul.f32 0.0625, %v460_v18  ;;  %1668 = vmatpush1.msra.mxu1 %v1489_v61 }
  0xe1   : > { %v838_v25 = vrot.slane %v579_v21, %v3002_v16  ;;  %1669 = vmatprep.subr.mxu1 %v1488_v2  ;;  %v1483_v21 = vunpack.c.l.bf16 %v1376_v7  ;;  %v1369_v2 = vld [vmem:[#allocation5 + $0x20] sm:$0xff] }
  0xe2   : > { %v947_v26 = vrot.slane %v600_v22, %v2973_v37  ;;  %v442_v27 = vpop.xlane.xlu1 %441  ;;  %1670 = vmatpush1.msra.mxu1 %v1487_v5  ;;  %v1472_v5 = vunpack.c.h.bf16 %v1370_v59 }
  0xe3   : > { %v421_v28 = vpop.xlane.xlu0 %420  ;;  %v840_v29 = vsel %vm839_vm4, %v838_v25, %v833_v12  ;;  %v594_v33 = vmul.f32 0.0625, %v442_v27  ;;  %v1375_v12 = vld [vmem:[#allocation5 + $0x50] sm:$0xff]  ;;  %1671 = vmatprep.subr.mxu1 %v1486_v6 }
  0xe4   : > { %v948_v31 = vsel %vm818_vm1, %v947_v26, %v943_v23  ;;  %v587_v35 = vmul.f32 0.0625, %v421_v28  ;;  %v1482_v22 = vunpack.c.h.bf16 %v1375_v12  ;;  %v1374_v23 = vld [vmem:[#allocation5 + $0x48] sm:$0xff]  ;;  %1672 = vmatpush1.msra.mxu1 %v1485_v13  ;;  %v1470_v13 = vunpack.c.h.bf16 %v1369_v2 }
  0xe5   : > { %v918_v36 = vrot.slane %v594_v33, %v2992_v0  ;;  %1673 = vmatprep.subr.mxu1 %v1484_v17 }
  0xe6   : > { %v884_v38 = vrot.slane %v587_v35, %v3002_v16  ;;  %v481_v40 = vpop.xlane.xlu1 %480  ;;  %1674 = vmatpush1.msra.mxu1 %v1483_v21 }
  0xe7   : > { %v463_v41 = vpop.xlane.xlu0 %462  ;;  %v919_v43 = vsel %vm832_vm3, %v918_v36, %v914_v19  ;;  %v607_v46 = vmul.f32 0.0625, %v481_v40  ;;  %v848_v36 = vadd.s32 4294967248, %v2958_v20  ;;  %1675 = vmatprep.subr.mxu1 %v1482_v22  ;;  %v1366_v22 = vld [vmem:[#allocation5 + $0x8] sm:$0xff] }
  0xe8   : > { %v885_v44 = vsel %vm839_vm4, %v884_v38, %v880_v11  ;;  %v601_v45 = vmul.f32 0.0625, %v463_v41  ;;  %v1480_v38 = vunpack.c.h.bf16 %v1374_v23  ;;  %v1479_v41 = vunpack.c.l.bf16 %v1374_v23 }
  0xe9   : > { %v982_v62 = vrot.slane %v607_v46, %v2970_v34 }
  0xea   : > { %v952_v47 = vrot.slane %v601_v45, %v2976_v42  ;;  %v400_v49 = vpop.xlane.xlu1 %399 }
  0xeb   : > { %v484_v50 = vpop.xlane.xlu0 %483  ;;  %v580_v55 = vmul.f32 0.0625, %v400_v49 }
  0xec   : > { %v953_v54 = vsel %vm825_vm2, %v952_v47, %v948_v31  ;;  %v608_v56 = vmul.f32 0.0625, %v484_v50  ;;  %v1481_v31 = vunpack.c.l.bf16 %v1375_v12 }
  0xed   : > { %v845_v63 = vrot.slane %v580_v55, %v3017_v48  ;;  %v3045_v55 = vsub.s32 %v848_v36, %v2960_v24 }
  0xee   : > { %v986_v1 = vrot.slane %v608_v56, %v2973_v37  ;;  %v445_v3 = vpop.xlane.xlu1 %444  ;;  %1676 = vmatpush1.msra.mxu1 %v1481_v31 }
  0xef   : > { %v424_v4 = vpop.xlane.xlu0 %423  ;;  %v3024_v8 = vsel %vm846_vm5, %v845_v63, %v840_v29  ;;  %v595_v10 = vmul.f32 0.0625, %v445_v3  ;;  %v1373_v29 = vld [vmem:[#allocation5 + $0x40] sm:$0xff]  ;;  %1677 = vmatprep.subr.mxu1 %v1480_v38  ;;  %v1474_v63 = vunpack.c.h.bf16 %v1371_v51 }
  0xf0   : > { %v987_v9 = vsel %vm818_vm1, %v986_v1, %v982_v62  ;;  %v588_v11 = vmul.f32 0.0625, %v424_v4  ;;  %v1477_v50 = vunpack.c.l.bf16 %v1373_v29  ;;  %1678 = vmatpush1.msra.mxu1 %v1479_v41  ;;  %v1473_v1 = vunpack.c.l.bf16 %v1371_v51 }
  0xf1   : > { %v923_v14 = vrot.slane %v595_v10, %v3002_v16  ;;  %v1368_v10 = vld [vmem:[#allocation5 + $0x18] sm:$0xff] }
  0xf2   : > { %v889_v15 = vrot.slane %v588_v11, %v3017_v48  ;;  %v487_v18 = vpop.xlane.xlu1 %486  ;;  %v1468_v17 = vunpack.c.h.bf16 %v1368_v10  ;;  %v1467_v21 = vunpack.c.l.bf16 %v1368_v10 }
  0xf3   : > { %v466_v19 = vpop.xlane.xlu0 %465  ;;  %v3030_v25 = vsel %vm839_vm4, %v923_v14, %v919_v43  ;;  %v609_v27 = vmul.f32 0.0625, %v487_v18  ;;  %v1478_v43 = vunpack.c.h.bf16 %v1373_v29  ;;  %v1469_v14 = vunpack.c.l.bf16 %v1369_v2 }
  0xf4   : > { %v890_v26 = vsel %vm846_vm5, %v889_v15, %v885_v44  ;;  %v602_v28 = vmul.f32 0.0625, %v466_v19  ;;  %v1372_v44 = vld [vmem:[#allocation5 + $0x38] sm:$0xff]  ;;  %v1367_v15 = vld [vmem:[#allocation5 + $0x10] sm:$0xff] }
  0xf5   : > { %v991_v33 = vrot.slane %v609_v27, %v2976_v42  ;;  %v1476_v56 = vunpack.c.h.bf16 %v1372_v44  ;;  %1679 = vmatprep.subr.mxu1 %v1478_v43  ;;  %v1466_v23 = vunpack.c.h.bf16 %v1367_v15  ;;  %v1365_v27 = vld [vmem:[#allocation5] sm:$0xff] }
  0xf6   : > { %v957_v35 = vrot.slane %v602_v28, %v2992_v0  ;;  %v508_v39 = vpop.xlane.xlu1 %507  ;;  %1680 = vmatpush1.msra.mxu1 %v1477_v50  ;;  %v1464_v28 = vunpack.c.h.bf16 %v1366_v22  ;;  %v1462_v36 = vunpack.c.h.bf16 %v1365_v27  ;;  %v1461_v38 = vunpack.c.l.bf16 %v1365_v27 }
  0xf7   : > { %v505_v40 = vpop.xlane.xlu0 %504  ;;  %v3037_v45 = vsel %vm825_vm2, %v991_v33, %v987_v9  ;;  %v616_v47 = vmul.f32 0.0625, %v508_v39  ;;  %1681 = vmatprep.subr.mxu1 %v1476_v56  ;;  %v1471_v9 = vunpack.c.l.bf16 %v1370_v59  ;;  %v1463_v33 = vunpack.c.l.bf16 %v1366_v22  ;;  %v1395_v39 = vld [vmem:[#allocation5 + $0xf0] sm:$0xff] }
  0xf8   : > { %v3040_v46 = vsel %vm832_vm3, %v957_v35, %v953_v54  ;;  %v615_v49 = vmul.f32 0.0625, %v505_v40  ;;  %v1475_v54 = vunpack.c.l.bf16 %v1372_v44  ;;  %v1396_v35 = vld [vmem:[#allocation5 + $0xf8] sm:$0xff]  ;;  %v1522_v51 = vunpack.c.h.bf16 %v1395_v39 }
  0xf9   : > { %v1025_v52 = vrot.slane %v616_v47, %v2973_v37  ;;  %v1524_v41 = vunpack.c.h.bf16 %v1396_v35  ;;  %v1523_v44 = vunpack.c.l.bf16 %v1396_v35  ;;  %v1394_v47 = vld [vmem:[#allocation5 + $0xe8] sm:$0xff] }
  0xfa   : > { %v1021_v53 = vrot.slane %v615_v49, %v2970_v34  ;;  %v427_v57 = vpop.xlane.xlu1 %426  ;;  %1682 = vmatpush1.msra.mxu1 %v1475_v54 }
  0xfb   : > { %v403_v58 = vpop.xlane.xlu0 %402  ;;  %v589_v61 = vmul.f32 0.0625, %v427_v57  ;;  %1683 = vmatprep.subr.mxu1 %v1474_v63 }
  0xfc   : > { %v3048_v60 = vsel %vm818_vm1, %v1025_v52, %v1021_v53  ;;  %v581_v62 = vmul.f32 0.0625, %v403_v58  ;;  %1684 = vmatpush1.msra.mxu1 %v1473_v1  ;;  %v1521_v52 = vunpack.c.l.bf16 %v1395_v39  ;;  %v1393_v53 = vld [vmem:[#allocation5 + $0xe0] sm:$0xff]  ;;  %v1520_v58 = vunpack.c.h.bf16 %v1394_v47 }
  0xfd   : > { %v894_v3 = vrot.slane %v589_v61, %v3045_v55  ;;  %1685 = vmatprep.subr.mxu1 %v1472_v5  ;;  %v1519_v61 = vunpack.c.l.bf16 %v1394_v47  ;;  %v1518_v2 = vunpack.c.h.bf16 %v1393_v53  ;;  %v1391_v5 = vld [vmem:[#allocation5 + $0xd0] sm:$0xff] }
  0xfe   : > { %v852_v4 = vrot.slane %v581_v62, %v3045_v55  ;;  %v3052_v6 = vpop.xlane.xlu1 %468  ;;  %1686 = vmatpush1.msra.mxu1 %v1471_v9  ;;  %v1392_v62 = vld [vmem:[#allocation5 + $0xd8] sm:$0xff] }
  0xff   : > { %v3054_v7 = vpop.xlane.xlu0 %447  ;;  %v895_v11 = vsel %vm853_vm6, %v894_v3, %v890_v26  ;;  %1687 = vmatprep.subr.mxu1 %v1470_v13  ;;  %v1465_v26 = vunpack.c.l.bf16 %v1367_v15  ;;  %v1516_v9 = vunpack.c.h.bf16 %v1392_v62  ;;  %v1390_v15 = vld [vmem:[#allocation5 + $0xc8] sm:$0xff] }
 0x100   : > { %v854_v12 = vsel %vm853_vm6, %v852_v4, %v3024_v8  ;;  %1688 = vmatpush1.msra.mxu1 %v1469_v14  ;;  %v855_v8 = vadd.s32 4294967240, %v2958_v20  ;;  %v1517_v4 = vunpack.c.l.bf16 %v1393_v53  ;;  %v1515_v14 = vunpack.c.l.bf16 %v1392_v62  ;;  %v1384_v62 = vld [vmem:[#allocation5 + $0x98] sm:$0xff] }
 0x101   : > { %1689 = vmatprep.subr.mxu1 %v1468_v17  ;;  %v1514_v17 = vunpack.c.h.bf16 %v1391_v5  ;;  %v1512_v22 = vunpack.c.h.bf16 %v1390_v15 }
 0x102   : > { %v3059_v18 = vpop.xlane.xlu1 %510  ;;  %1690 = vmatpush1.msra.mxu1 %v1467_v21  ;;  %v3069_v40 = vsub.s32 %v855_v8, %v2960_v24  ;;  %v596_v21 = vmul.f32 0.0625, %v3054_v7  ;;  %v1511_v8 = vunpack.c.l.bf16 %v1390_v15 }
 0x103   : > { %v3061_v19 = vpop.xlane.xlu0 %489  ;;  %1691 = vmatprep.subr.mxu1 %v1466_v23 }
 0x104   : > { %1692 = vmatpush1.msra.mxu1 %v1465_v26 }
 0x105   : > { %1693 = vmatprep.subr.mxu1 %v1464_v28  ;;  %v1388_v28 = vld [vmem:[#allocation5 + $0xb8] sm:$0xff] }
 0x106   : > { %v3064_v29 = vpop.xlane.xlu1 %531  ;;  %1694 = vmatpush1.msra.mxu1 %v1463_v33  ;;  %v1508_v39 = vunpack.c.h.bf16 %v1388_v28 }
 0x107   : > { %v3066_v31 = vpop.xlane.xlu0 %528  ;;  %1695 = vmatprep.subr.mxu1 %v1462_v36  ;;  %v1387_v36 = vld [vmem:[#allocation5 + $0xb0] sm:$0xff] }
 0x108   : > { %1696 = vmatpush1.msra.mxu1 %v1461_v38  ;;  %v928_v38 = vrot.slane %v596_v21, %v3017_v48 }
 0x109   : > { %1697 = vmatprep.subr.mxu1 %v1524_v41 }
 0x10a   : > { %v430_v20 = vpop.xlane.xlu1 %429  ;;  %1698 = vmatpush2.msra.mxu1 %v1523_v44  ;;  %v1386_v44 = vld [vmem:[#allocation5 + $0xa8] sm:$0xff] }
 0x10b   : > { %v406_v43 = vpop.xlane.xlu0 %405  ;;  %v590_v49 = vmul.f32 0.0625, %v430_v20  ;;  %1699 = vmatprep.subr.mxu1 %v1522_v51  ;;  %v1385_v51 = vld [vmem:[#allocation5 + $0xa0] sm:$0xff] }
 0x10c   : > { %v582_v50 = vmul.f32 0.0625, %v406_v43  ;;  %1700 = vmatpush2.msra.mxu1 %v1521_v52  ;;  %v1507_v43 = vunpack.c.l.bf16 %v1388_v28  ;;  %v929_v52 = vsel %vm846_vm5, %v928_v38, %v3030_v25  ;;  %v1501_v25 = vunpack.c.l.bf16 %v1385_v51 }
 0x10d   : > { %v899_v56 = vrot.slane %v590_v49, %v3069_v40  ;;  %1701 = vmatprep.subr.mxu1 %v1520_v58  ;;  %v1506_v49 = vunpack.c.h.bf16 %v1387_v36 }
 0x10e   : > { %v859_v57 = vrot.slane %v582_v50, %v3069_v40  ;;  %v3073_v54 = vpop.xlane.xlu1 %471  ;;  %1702 = vmatpush2.msra.mxu1 %v1519_v61  ;;  %v1505_v50 = vunpack.c.l.bf16 %v1387_v36  ;;  %v1503_v61 = vunpack.c.l.bf16 %v1386_v44 }
 0x10f   : > { %v451_v59 = vpop.xlane.xlu0 %450  ;;  %v900_v63 = vsel %vm860_vm7, %v899_v56, %v895_v11  ;;  %1703 = vmatprep.subr.mxu1 %v1518_v2  ;;  %v1513_v11 = vunpack.c.l.bf16 %v1391_v5  ;;  %v1504_v56 = vunpack.c.h.bf16 %v1386_v44  ;;  %v603_v2 = vmul.f32 0.0625, %v3052_v6  ;;  %v3096_v5 = vld [vmem:[#allocation5 + $0x90] sm:$0xff] }
 0x110   : > { %v861_v1 = vsel %vm860_vm7, %v859_v57, %v854_v12  ;;  %1704 = vmatpush2.msra.mxu1 %v1517_v4  ;;  %v1389_v12 = vld [vmem:[#allocation5 + $0xc0] sm:$0xff]  ;;  %v597_v23 = vmul.f32 0.0625, %v451_v59  ;;  %v1498_v21 = vunpack.c.h.bf16 %v3096_v5 }
 0x111   : > { %v1136_v3 = vsel %vm1135_vm8, %v900_v63, %v861_v1  ;;  %1705 = vmatprep.subr.mxu1 %v1516_v9  ;;  %v1510_v33 = vunpack.c.h.bf16 %v1389_v12  ;;  %v1509_v35 = vunpack.c.l.bf16 %v1389_v12  ;;  %v1502_v1 = vunpack.c.h.bf16 %v1385_v51 }
 0x112   : > { %v3077_v10 = vpop.xlane.xlu1 %513  ;;  %1706 = vmatpush2.msra.mxu1 %v1515_v14  ;;  %v933_v7 = vrot.slane %v597_v23, %v3045_v55  ;;  %v604_v9 = vmul.f32 0.0625, %v3073_v54  ;;  %v1500_v14 = vunpack.c.h.bf16 %v1384_v62  ;;  %v1499_v12 = vunpack.c.l.bf16 %v1384_v62 }
 0x113   : > { %v3079_v13 = vpop.xlane.xlu0 %492  ;;  %1707 = vmatprep.subr.mxu1 %v1514_v17  ;;  %v962_v6 = vrot.slane %v603_v2, %v3002_v16  ;;  %v618_v62 = vmul.f32 0.0625, %v3077_v10 }
 0x114   : > { %1708 = vmatpush2.msra.mxu1 %v1513_v11  ;;  %v934_v57 = vsel %vm853_vm6, %v933_v7, %v929_v52  ;;  %v610_v7 = vmul.f32 0.0625, %v3061_v19  ;;  %v617_v52 = vmul.f32 0.0625, %v3059_v18 }
 0x115   : > { %1709 = vmatprep.subr.mxu1 %v1512_v22  ;;  %v963_v28 = vsel %vm839_vm4, %v962_v6, %v3040_v46 }
 0x116   : > { %v3082_v26 = vpop.xlane.xlu1 %552  ;;  %1710 = vmatpush2.msra.mxu1 %v1511_v8  ;;  %v996_v51 = vrot.slane %v610_v7, %v2992_v0  ;;  %v1030_v18 = vrot.slane %v617_v52, %v2976_v42 }
 0x117   : > { %v3084_v27 = vpop.xlane.xlu0 %534  ;;  %1711 = vmatprep.subr.mxu1 %v1510_v33 }
 0x118   : > { %1712 = vmatpush2.msra.mxu1 %v1509_v35 }
 0x119   : > { %1713 = vmatprep.subr.mxu1 %v1508_v39 }
 0x11a   : > { %v454_v41 = vpop.xlane.xlu1 %453  ;;  %1714 = vmatpush2.msra.mxu1 %v1507_v43  ;;  %v611_v43 = vmul.f32 0.0625, %v3079_v13 }
 0x11b   : > { %v3088_v20 = vpop.xlane.xlu0 %555  ;;  %v598_v47 = vmul.f32 0.0625, %v454_v41  ;;  %1715 = vmatprep.subr.mxu1 %v1506_v49 }
 0x11c   : > { %1716 = vmatpush2.msra.mxu1 %v1505_v50 }
 0x11d   : > { %v938_v53 = vrot.slane %v598_v47, %v3069_v40  ;;  %1717 = vmatprep.subr.mxu1 %v1504_v56  ;;  %v1001_v56 = vrot.slane %v611_v43, %v3002_v16 }
 0x11e   : > { %v496_v58 = vpop.xlane.xlu1 %495  ;;  %1718 = vmatpush2.msra.mxu1 %v1503_v61 }
 0x11f   : > { %v475_v59 = vpop.xlane.xlu0 %474  ;;  %v939_v63 = vsel %vm860_vm7, %v938_v53, %v934_v57  ;;  %1719 = vmatprep.subr.mxu1 %v1502_v1  ;;  %v612_v47 = vmul.f32 0.0625, %v496_v58  ;;  %v624_v53 = vmul.f32 0.0625, %v3064_v29  ;;  %v623_v57 = vmul.f32 0.0625, %v3066_v31 }
 0x120   : > { %v1138_v4 = vsel %vm1137_vm9, %v939_v63, %v1136_v3  ;;  %v605_v15 = vmul.f32 0.0625, %v475_v59  ;;  %1720 = vmatpush2.msra.mxu1 %v1501_v25  ;;  %v967_v3 = vrot.slane %v604_v9, %v3017_v48  ;;  %v997_v58 = vsel %vm832_vm3, %v996_v51, %v3037_v45 }
 0x121   : > { %1721 = vmatprep.subr.mxu1 %v1500_v14  ;;  %v1006_v19 = vrot.slane %v612_v47, %v3017_v48  ;;  %v1064_v29 = vrot.slane %v624_v53, %v2973_v37  ;;  %v1002_v1 = vsel %vm839_vm4, %v1001_v56, %v997_v58  ;;  %v1060_v2 = vrot.slane %v623_v57, %v2970_v34 }
 0x122   : > { %v3099_v17 = vpop.xlane.xlu1 %537  ;;  %v972_v22 = vrot.slane %v605_v15, %v3045_v55  ;;  %1722 = vmatpush2.msra.mxu1 %v1499_v12  ;;  %v968_v33 = vsel %vm846_vm5, %v967_v3, %v963_v28  ;;  %v1035_v12 = vrot.slane %v618_v62, %v2992_v0 }
 0x123   : > { %v517_v11 = vpop.xlane.xlu0 %516  ;;  %1723 = vmatprep.subr.mxu1 %v1498_v21  ;;  %v631_v21 = vmul.f32 0.0625, %v3082_v26  ;;  %v626_v28 = vmul.f32 0.0625, %v3099_v17  ;;  %v632_v26 = vmul.f32 0.0625, %v3088_v20 }
 0x124   : > { %v973_v36 = vsel %vm853_vm6, %v972_v22, %v968_v33  ;;  %v619_v31 = vmul.f32 0.0625, %v517_v11  ;;  %v625_v11 = vmul.f32 0.0625, %v3084_v27 }
 0x125   : > { %v1074_v20 = vrot.slane %v626_v28, %v2992_v0  ;;  %v1103_v52 = vrot.slane %v632_v26, %v2973_v37 }
 0x126   : > { %v478_v54 = vpop.xlane.xlu1 %477  ;;  %v1040_v3 = vrot.slane %v619_v31, %v3002_v16 }
 0x127   : > { %v559_v23 = vpop.xlane.xlu0 %558  ;;  %v606_v8 = vmul.f32 0.0625, %v478_v54  ;;  %v1031_v54 = vsel %vm825_vm2, %v1030_v18, %v3048_v60 }
 0x128   : > { %v1036_v7 = vsel %vm832_vm3, %v1035_v12, %v1031_v54  ;;  %v655_v54 = vld [vmem:[#allocation2 + $0x80] sm:$0xff] }
 0x129   : > { %v977_v35 = vrot.slane %v606_v8, %v3069_v40  ;;  %v1065_v8 = vsel %vm818_vm1, %v1064_v29, %v1060_v2  ;;  %v1041_v17 = vsel %vm839_vm4, %v1040_v3, %v1036_v7 }
 0x12a   : > { %v520_v38 = vpop.xlane.xlu1 %519 }
 0x12b   : > { %v499_v39 = vpop.xlane.xlu0 %498  ;;  %v978_v41 = vsel %vm860_vm7, %v977_v35, %v973_v36  ;;  %v620_v25 = vmul.f32 0.0625, %v520_v38  ;;  %v633_v35 = vmul.f32 0.0625, %v559_v23 }
 0x12c   : > { %v1140_v44 = vsel %vm1139_vm10, %v978_v41, %v1138_v4  ;;  %v613_v49 = vmul.f32 0.0625, %v499_v39  ;;  %v1007_v4 = vsel %vm846_vm5, %v1006_v19, %v1002_v1  ;;  %v1099_v41 = vrot.slane %v631_v21, %v2970_v34 }
 0x12d   : > { %v1045_v33 = vrot.slane %v620_v25, %v3017_v48  ;;  %v1108_v53 = vrot.slane %v633_v35, %v2976_v42 }
 0x12e   : > { %v562_v50 = vpop.xlane.xlu1 %561  ;;  %v1011_v59 = vrot.slane %v613_v49, %v3045_v55  ;;  %v1104_v1 = vsel %vm818_vm1, %v1103_v52, %v1099_v41 }
 0x12f   : > { %v541_v46 = vpop.xlane.xlu0 %540  ;;  %v634_v47 = vmul.f32 0.0625, %v562_v50  ;;  %v1046_v23 = vsel %vm846_vm5, %v1045_v33, %v1041_v17  ;;  %v640_v17 = vld [vmem:[#allocation2 + $0x8] sm:$0xff] }
 0x130   : > { %v1012_v45 = vsel %vm853_vm6, %v1011_v59, %v1007_v4  ;;  %v627_v36 = vmul.f32 0.0625, %v541_v46 }
 0x131   : > { %v1113_v62 = vrot.slane %v634_v47, %v2992_v0  ;;  %v1109_v0 = vsel %vm825_vm2, %v1108_v53, %v1104_v1  ;;  %v641_v1 = vld [vmem:[#allocation2 + $0x10] sm:$0xff] }
 0x132   : > { %v523_v13 = vpop.xlane.xlu1 %522  ;;  %v1079_v34 = vrot.slane %v627_v36, %v3002_v16  ;;  %v695_v36 = vunpack.c.l.bf16 %v655_v54 }
 0x133   : > { %v502_v61 = vpop.xlane.xlu0 %501  ;;  %v621_v14 = vmul.f32 0.0625, %v523_v13 }
 0x134   : > { %v614_v63 = vmul.f32 0.0625, %v502_v61 }
 0x135   : > { %v1050_v27 = vrot.slane %v621_v14, %v3045_v55 }
 0x136   : > { %v1016_v9 = vrot.slane %v614_v63, %v3069_v40  ;;  %v565_v10 = vpop.xlane.xlu1 %564 }
 0x137   : > { %v544_v15 = vpop.xlane.xlu0 %543  ;;  %v635_v46 = vmul.f32 0.0625, %v565_v10  ;;  %v1051_v56 = vsel %vm853_vm6, %v1050_v27, %v1046_v23  ;;  %v1114_v10 = vsel %vm832_vm3, %v1113_v62, %v1109_v0  ;;  %v649_v27 = vld [vmem:[#allocation2 + $0x50] sm:$0xff]  ;;  %v666_v23 = vunpack.c.h.bf16 %v640_v17  ;;  %v647_v62 = vld [vmem:[#allocation2 + $0x40] sm:$0xff] }
 0x138   : > { %v1017_v6 = vsel %vm860_vm7, %v1016_v9, %v1012_v45  ;;  %v628_v43 = vmul.f32 0.0625, %v544_v15  ;;  %v684_v7 = vunpack.c.h.bf16 %v649_v27  ;;  %v683_v41 = vunpack.c.l.bf16 %v649_v27  ;;  %v1411_v0 = vld [vmem:[#allocation5 + $0x170] sm:$0xff] }
 0x139   : > { %v1142_v22 = vsel %vm1141_vm11, %v1017_v6, %v1140_v44  ;;  %v1069_v44 = vrot.slane %v625_v11, %v2976_v42  ;;  %v1118_v18 = vrot.slane %v635_v46, %v3002_v16  ;;  %v658_v6 = vld [vmem:[#allocation2 + $0x98] sm:$0xff]  ;;  %v665_v46 = vunpack.c.l.bf16 %v640_v17 }
 0x13a   : > { %v547_v38 = vpop.xlane.xlu1 %546  ;;  %v1084_v50 = vrot.slane %v628_v43, %v3017_v48  ;;  %v702_v33 = vunpack.c.h.bf16 %v658_v6  ;;  %v701_v35 = vunpack.c.l.bf16 %v658_v6  ;;  %v643_v43 = vld [vmem:[#allocation2 + $0x20] sm:$0xff] }
 0x13b   : > { %v526_v39 = vpop.xlane.xlu0 %525  ;;  %v629_v49 = vmul.f32 0.0625, %v547_v38  ;;  %v1070_v58 = vsel %vm825_vm2, %v1069_v44, %v1065_v8  ;;  %v1119_v15 = vsel %vm839_vm4, %v1118_v18, %v1114_v10  ;;  %v672_v47 = vunpack.c.h.bf16 %v643_v43 }
 0x13c   : > { %v622_v60 = vmul.f32 0.0625, %v526_v39  ;;  %v1075_v63 = vsel %vm832_vm3, %v1074_v20, %v1070_v58  ;;  %v646_v39 = vld [vmem:[#allocation2 + $0x38] sm:$0xff]  ;;  %v680_v18 = vunpack.c.h.bf16 %v647_v62  ;;  %v1554_v10 = vunpack.c.h.bf16 %v1411_v0 }
 0x13d   : > { %v1089_v37 = vrot.slane %v629_v49, %v3045_v55  ;;  %v1080_v31 = vsel %vm839_vm4, %v1079_v34, %v1075_v63  ;;  %v677_v44 = vunpack.c.l.bf16 %v646_v39  ;;  %v671_v49 = vunpack.c.l.bf16 %v643_v43  ;;  %v662_v20 = vld [vmem:[#allocation2 + $0xb8] sm:$0xff]  ;;  %v656_v34 = vld [vmem:[#allocation2 + $0x88] sm:$0xff] }
 0x13e   : > { %v1055_v51 = vrot.slane %v622_v60, %v3069_v40  ;;  %v550_v57 = vpop.xlane.xlu1 %549  ;;  %v1085_v9 = vsel %vm846_vm5, %v1084_v50, %v1080_v31  ;;  %v678_v60 = vunpack.c.h.bf16 %v646_v39  ;;  %v710_v52 = vunpack.c.h.bf16 %v662_v20  ;;  %v644_v63 = vld [vmem:[#allocation2 + $0x28] sm:$0xff] }
 0x13f   : > { %v568_v19 = vpop.xlane.xlu0 %567  ;;  %v630_v13 = vmul.f32 0.0625, %v550_v57  ;;  %v1090_v16 = vsel %vm853_vm6, %v1089_v37, %v1085_v9  ;;  %v709_v53 = vunpack.c.l.bf16 %v662_v20  ;;  %v698_v50 = vunpack.c.h.bf16 %v656_v34 }
 0x140   : > { %v1056_v59 = vsel %vm860_vm7, %v1055_v51, %v1051_v56  ;;  %v636_v61 = vmul.f32 0.0625, %v568_v19  ;;  %v659_v51 = vld [vmem:[#allocation2 + $0xa0] sm:$0xff]  ;;  %v653_v19 = vld [vmem:[#allocation2 + $0x70] sm:$0xff]  ;;  %v674_v31 = vunpack.c.h.bf16 %v644_v63 }
 0x141   : > { %v1144_v42 = vsel %vm1143_vm12, %v1056_v59, %v1142_v22  ;;  %v1094_v29 = vrot.slane %v630_v13, %v3069_v40  ;;  %v707_v22 = vunpack.c.l.bf16 %v2963_v30  ;;  %v704_v56 = vunpack.c.h.bf16 %v659_v51  ;;  %v650_v13 = vld [vmem:[#allocation2 + $0x58] sm:$0xff] }
 0x142   : > { %v1123_v2 = vrot.slane %v636_v61, %v3017_v48  ;;  %v574_v25 = vpop.xlane.xlu1 %573  ;;  %v703_v57 = vunpack.c.l.bf16 %v659_v51  ;;  %v697_v59 = vunpack.c.l.bf16 %v656_v34  ;;  %v692_v61 = vunpack.c.h.bf16 %v653_v19 }
 0x143   : > { %v571_v4 = vpop.xlane.xlu0 %570  ;;  %v638_v14 = vmul.f32 0.0625, %v574_v25  ;;  %v1095_v12 = vsel %vm860_vm7, %v1094_v29, %v1090_v16  ;;  %v691_v58 = vunpack.c.l.bf16 %v653_v19  ;;  %v686_v37 = vunpack.c.h.bf16 %v650_v13 }
 0x144   : > { %v637_v45 = vmul.f32 0.0625, %v571_v4  ;;  %v1124_v11 = vsel %vm846_vm5, %v1123_v2, %v1119_v15  ;;  %v1146_v28 = vsel %vm1145_vm13, %v1095_v12, %v1144_v42  ;;  %v685_v42 = vunpack.c.l.bf16 %v650_v13  ;;  %v1409_v15 = vld [vmem:[#allocation5 + $0x160] sm:$0xff] }
 0x145   : > { %v1133_v48 = vrot.slane %v638_v14, %v3069_v40  ;;  %v696_v40 = vunpack.c.h.bf16 %v655_v54  ;;  %v679_v29 = vunpack.c.l.bf16 %v647_v62  ;;  %v673_v2 = vunpack.c.l.bf16 %v644_v63  ;;  %v1410_v14 = vld [vmem:[#allocation5 + $0x168] sm:$0xff] }
 0x146   : > { %v1128_v21 = vrot.slane %v637_v45, %v3045_v55  ;;  %v652_v55 = vld [vmem:[#allocation2 + $0x68] sm:$0xff]  ;;  %v668_v4 = vunpack.c.h.bf16 %v641_v1  ;;  %v667_v25 = vunpack.c.l.bf16 %v641_v1  ;;  %v1553_v16 = vunpack.c.l.bf16 %v1411_v0  ;;  %v1381_v0 = vld [vmem:[#allocation5 + $0x80] sm:$0xff] }
 0x147   : > { %v690_v30 = vunpack.c.h.bf16 %v652_v55  ;;  %v689_v38 = vunpack.c.l.bf16 %v652_v55  ;;  %v1552_v12 = vunpack.c.h.bf16 %v1410_v14  ;;  %v1550_v6 = vunpack.c.h.bf16 %v1409_v15  ;;  %v1382_v1 = vld [vmem:[#allocation5 + $0x88] sm:$0xff] }
 0x148   : > { %v1129_v3 = vsel %vm853_vm6, %v1128_v21, %v1124_v11  ;;  %v1551_v21 = vunpack.c.l.bf16 %v1410_v14  ;;  %v1549_v11 = vunpack.c.l.bf16 %v1409_v15  ;;  %v1493_v14 = vunpack.c.l.bf16 %v1381_v0 }
 0x149   : > { %v1134_v8 = vsel %vm860_vm7, %v1133_v48, %v1129_v3  ;;  %v1408_v48 = vld [vmem:[#allocation5 + $0x158] sm:$0xff]  ;;  %v1407_v3 = vld [vmem:[#allocation5 + $0x150] sm:$0xff] }
 0x14a   : > { %v3178_v26 = vsel %vm1147_vm14, %v1134_v8, %v1146_v28  ;;  %v1547_v54 = vunpack.c.l.bf16 %v1408_v48  ;;  %v1406_v8 = vld [vmem:[#allocation5 + $0x148] sm:$0xff]  ;;  %v1546_v28 = vunpack.c.h.bf16 %v1407_v3 }
 0x14b   : > { %2351 = vmatmul.mubr.msk.f32.vlgmr.msra.gmra.mxu0 %vm1149_vm15, %v3178_v26  ;;  %v1543_v55 = vunpack.c.l.bf16 %v1406_v8 }
 0x14c   : > { %1240 = vmatpush1.msra.mxu0 %v707_v22  ;;  %1287 = vmatprep.mubr.f32.mxu0 %v2558_v32  ;;  %v1548_v22 = vunpack.c.h.bf16 %v1408_v48  ;;  %v1422_v48 = vld [vmem:[#allocation5 + $0x1c8] sm:$0xff] }
 0x14d   : > { %1241 = vmatprep.subr.mxu0 %v702_v33  ;;  %v1545_v33 = vunpack.c.l.bf16 %v1407_v3  ;;  %v1421_v3 = vld [vmem:[#allocation5 + $0x1c0] sm:$0xff] }
 0x14e   : > { %1242 = vmatpush1.msra.mxu0 %v701_v35  ;;  %v1544_v35 = vunpack.c.h.bf16 %v1406_v8  ;;  %v1420_v8 = vld [vmem:[#allocation5 + $0x1b8] sm:$0xff] }
 0x14f   : > { %1243 = vmatprep.subr.mxu0 %v696_v40  ;;  %v1404_v40 = vld [vmem:[#allocation5 + $0x138] sm:$0xff] }
 0x150   : > { %1244 = vmatpush1.msra.mxu0 %v695_v36  ;;  %v1539_v39 = vunpack.c.l.bf16 %v1404_v40 }
 0x151   : > { %1245 = vmatprep.subr.mxu0 %v690_v30  ;;  %v1403_v30 = vld [vmem:[#allocation5 + $0x130] sm:$0xff] }
 0x152   : > { %1246 = vmatpush1.msra.mxu0 %v689_v38  ;;  %v1540_v38 = vunpack.c.h.bf16 %v1404_v40  ;;  %v1537_v43 = vunpack.c.l.bf16 %v1403_v30  ;;  %v1418_v40 = vld [vmem:[#allocation5 + $0x1a8] sm:$0xff] }
 0x153   : > { %1247 = vmatprep.subr.mxu0 %v684_v7  ;;  %v1402_v7 = vld [vmem:[#allocation5 + $0x128] sm:$0xff] }
 0x154   : > { %1248 = vmatpush1.msra.mxu0 %v683_v41  ;;  %v1538_v41 = vunpack.c.h.bf16 %v1403_v30  ;;  %v1535_v17 = vunpack.c.l.bf16 %v1402_v7  ;;  %v1417_v30 = vld [vmem:[#allocation5 + $0x1a0] sm:$0xff] }
 0x155   : > { %1249 = vmatprep.subr.mxu0 %v678_v60  ;;  %v1401_v60 = vld [vmem:[#allocation5 + $0x120] sm:$0xff] }
 0x156   : > { %1250 = vmatpush1.msra.mxu0 %v677_v44  ;;  %v1536_v44 = vunpack.c.h.bf16 %v1402_v7  ;;  %v1533_v20 = vunpack.c.l.bf16 %v1401_v60  ;;  %v1416_v7 = vld [vmem:[#allocation5 + $0x198] sm:$0xff] }
 0x157   : > { %1251 = vmatprep.subr.mxu0 %v672_v47  ;;  %v1400_v47 = vld [vmem:[#allocation5 + $0x118] sm:$0xff] }
 0x158   : > { %1252 = vmatpush1.msra.mxu0 %v671_v49  ;;  %v1534_v49 = vunpack.c.h.bf16 %v1401_v60  ;;  %v1531_v51 = vunpack.c.l.bf16 %v1400_v47  ;;  %v1415_v60 = vld [vmem:[#allocation5 + $0x190] sm:$0xff] }
 0x159   : > { %1253 = vmatprep.subr.mxu0 %v666_v23  ;;  %v1399_v23 = vld [vmem:[#allocation5 + $0x110] sm:$0xff] }
 0x15a   : > { %1254 = vmatpush1.msra.mxu0 %v665_v46  ;;  %v1532_v46 = vunpack.c.h.bf16 %v1400_v47  ;;  %v1529_v34 = vunpack.c.l.bf16 %v1399_v23  ;;  %v1414_v47 = vld [vmem:[#allocation5 + $0x188] sm:$0xff] }
 0x15b   : > { %2352 = vmatmul.mubr.msk.f32.vlgmr.msra.gmra.mxu0 %vm1149_vm15, %v3178_v26  ;;  %1310 = vmatprep.subr.mxu0 %v710_v52  ;;  %v1398_v52 = vld [vmem:[#allocation5 + $0x108] sm:$0xff] }
 0x15c   : > { %1311 = vmatpush1.msra.mxu0 %v709_v53  ;;  %1358 = vmatprep.mubr.f32.mxu0 %v2558_v32  ;;  %v1412_v32 = vld [vmem:[#allocation5 + $0x178] sm:$0xff]  ;;  %v1530_v53 = vunpack.c.h.bf16 %v1399_v23  ;;  %v1527_v19 = vunpack.c.l.bf16 %v1398_v52  ;;  %v1413_v23 = vld [vmem:[#allocation5 + $0x180] sm:$0xff] }
 0x15d   : > { %1312 = vmatprep.subr.mxu0 %v704_v56  ;;  %v1556_v9 = vunpack.c.h.bf16 %v1412_v32  ;;  %v1555_v45 = vunpack.c.l.bf16 %v1412_v32  ;;  %v1397_v56 = vld [vmem:[#allocation5 + $0x100] sm:$0xff] }
 0x15e   : > { %1313 = vmatpush1.msra.mxu0 %v703_v57  ;;  %v1528_v57 = vunpack.c.h.bf16 %v1398_v52  ;;  %v1525_v13 = vunpack.c.l.bf16 %v1397_v56  ;;  %v1558_v52 = vunpack.c.h.bf16 %v1413_v23 }
 0x15f   : > { %1314 = vmatprep.subr.mxu0 %v698_v50  ;;  %v1428_v50 = vld [vmem:[#allocation5 + $0x1f8] sm:$0xff] }
 0x160   : > { %1315 = vmatpush1.msra.mxu0 %v697_v59  ;;  %v1526_v59 = vunpack.c.h.bf16 %v1397_v56  ;;  %v1587_v62 = vunpack.c.l.bf16 %v1428_v50  ;;  %v715_v56 = vsub.s32 0, %v2960_v24 }
 0x161   : > { %1316 = vmatprep.subr.mxu0 %v692_v61  ;;  %v1427_v61 = vld [vmem:[#allocation5 + $0x1f0] sm:$0xff] }
 0x162   : > { %1317 = vmatpush1.msra.mxu0 %v691_v58  ;;  %v1588_v58 = vunpack.c.h.bf16 %v1428_v50  ;;  %v1585_v63 = vunpack.c.l.bf16 %v1427_v61 }
 0x163   : > { %1318 = vmatprep.subr.mxu0 %v686_v37  ;;  %v1426_v37 = vld [vmem:[#allocation5 + $0x1e8] sm:$0xff] }
 0x164   : > { %1319 = vmatpush1.msra.mxu0 %v685_v42  ;;  %v1586_v42 = vunpack.c.h.bf16 %v1427_v61  ;;  %v1583_v32 = vunpack.c.l.bf16 %v1426_v37 }
 0x165   : > { %1320 = vmatprep.subr.mxu0 %v680_v18  ;;  %v1425_v18 = vld [vmem:[#allocation5 + $0x1e0] sm:$0xff] }
 0x166   : > { %1321 = vmatpush1.msra.mxu0 %v679_v29  ;;  %v1497_v29 = vunpack.c.l.bf16 %v3096_v5  ;;  %v3189_v5 = vld [vmem:[#allocation5 + $0x278] sm:$0xff] }
 0x167   : > { %1322 = vmatprep.subr.mxu0 %v674_v31  ;;  %v1584_v31 = vunpack.c.h.bf16 %v1426_v37  ;;  %v1442_v37 = vld [vmem:[#allocation5 + $0x268] sm:$0xff] }
 0x168   : > { %1323 = vmatpush1.msra.mxu0 %v673_v2  ;;  %v1496_v2 = vunpack.c.h.bf16 %v1382_v1  ;;  %1724 = vmatpush2.msra.mxu1 %v1497_v29  ;;  %v1441_v29 = vld [vmem:[#allocation5 + $0x260] sm:$0xff] }
 0x169   : > { %1324 = vmatprep.subr.mxu0 %v668_v4  ;;  %v1424_v4 = vld [vmem:[#allocation5 + $0x1d8] sm:$0xff] }
 0x16a   : > { %1325 = vmatpush1.msra.mxu0 %v667_v25  ;;  %v1495_v25 = vunpack.c.l.bf16 %v1382_v1  ;;  %1725 = vmatprep.subr.mxu1 %v1496_v2  ;;  %v1580_v15 = vunpack.c.h.bf16 %v1424_v4  ;;  %v1616_v1 = vunpack.c.h.bf16 %v1442_v37  ;;  %v1440_v2 = vld [vmem:[#allocation5 + $0x258] sm:$0xff] }
 0x16b   : > { %2353 = vmatmul.mubr.msk.f32.vlgmr.msra.gmra.mxu0 %vm1149_vm15, %v3178_v26  ;;  %1736 = vmatprep.subr.mxu0 %v1556_v9  ;;  %v1405_v26 = vld [vmem:[#allocation5 + $0x140] sm:$0xff]  ;;  %v1582_v9 = vunpack.c.h.bf16 %v1425_v18 }
 0x16c   : > { %1737 = vmatpush1.msra.mxu0 %v1555_v45  ;;  %v1542_v36 = vunpack.c.h.bf16 %v1405_v26  ;;  %v1541_v27 = vunpack.c.l.bf16 %v1405_v26  ;;  %v1494_v45 = vunpack.c.h.bf16 %v1381_v0  ;;  %1726 = vmatpush2.msra.mxu1 %v1495_v25  ;;  %v1419_v26 = vld [vmem:[#allocation5 + $0x1b0] sm:$0xff]  ;;  %v1612_v0 = vunpack.c.h.bf16 %v1440_v2 }
 0x16d   : > { %1738 = vmatprep.subr.mxu0 %v1554_v10  ;;  %v1581_v10 = vunpack.c.l.bf16 %v1425_v18  ;;  %v1439_v25 = vld [vmem:[#allocation5 + $0x250] sm:$0xff] }
 0x16e   : > { %1739 = vmatpush1.msra.mxu0 %v1553_v16  ;;  %v1423_v16 = vld [vmem:[#allocation5 + $0x1d0] sm:$0xff]  ;;  %1727 = vmatprep.subr.mxu1 %v1494_v45  ;;  %v727_v45 = vsub.s32 3, %v2960_v24 }
 0x16f   : > { %1740 = vmatprep.subr.mxu0 %v1552_v12  ;;  %v1620_v12 = vunpack.c.h.bf16 %v3189_v5  ;;  %1728 = vmatpush2.msra.mxu1 %v1493_v14  ;;  %v1438_v14 = vld [vmem:[#allocation5 + $0x248] sm:$0xff] }
 0x170   : > { %1741 = vmatpush1.msra.mxu0 %v1551_v21  ;;  %v1579_v21 = vunpack.c.l.bf16 %v1424_v4  ;;  %v1613_v4 = vunpack.c.l.bf16 %v1441_v29 }
 0x171   : > { %1742 = vmatprep.subr.mxu0 %v1550_v6  ;;  %v1578_v6 = vunpack.c.h.bf16 %v1423_v16  ;;  %1807 = vmatprep.subr.mxu1 %v1620_v12  ;;  %v1608_v12 = vunpack.c.h.bf16 %v1438_v14 }
 0x172   : > { %1743 = vmatpush1.msra.mxu0 %v1549_v11  ;;  %v1577_v11 = vunpack.c.l.bf16 %v1423_v16  ;;  %v1610_v16 = vunpack.c.h.bf16 %v1439_v25 }
 0x173   : > { %1744 = vmatprep.subr.mxu0 %v1548_v22  ;;  %v1576_v22 = vunpack.c.h.bf16 %v1422_v48 }
 0x174   : > { %1745 = vmatpush1.msra.mxu0 %v1547_v54  ;;  %v1575_v54 = vunpack.c.l.bf16 %v1422_v48  ;;  %v1607_v48 = vunpack.c.l.bf16 %v1438_v14  ;;  %v1454_v14 = vld [vmem:[#allocation5 + $0x2c8] sm:$0xff] }
 0x175   : > { %1746 = vmatprep.subr.mxu0 %v1546_v28  ;;  %v1574_v28 = vunpack.c.h.bf16 %v1421_v3 }
 0x176   : > { %1747 = vmatpush1.msra.mxu0 %v1545_v33  ;;  %v1573_v33 = vunpack.c.l.bf16 %v1421_v3 }
 0x177   : > { %1748 = vmatprep.subr.mxu0 %v1544_v35  ;;  %v1572_v35 = vunpack.c.h.bf16 %v1420_v8 }
 0x178   : > { %1749 = vmatpush1.msra.mxu0 %v1543_v55  ;;  %v1571_v55 = vunpack.c.l.bf16 %v1420_v8  ;;  %v1435_v8 = vld [vmem:[#allocation5 + $0x230] sm:$0xff] }
 0x179   : > { %1750 = vmatprep.subr.mxu0 %v1542_v36  ;;  %v1570_v36 = vunpack.c.h.bf16 %v1419_v26 }
 0x17a   : > { %1751 = vmatpush1.msra.mxu0 %v1541_v27  ;;  %v1569_v27 = vunpack.c.l.bf16 %v1419_v26 }
 0x17b   : > { %1752 = vmatprep.subr.mxu0 %v1540_v38  ;;  %v1568_v38 = vunpack.c.h.bf16 %v1418_v40 }
 0x17c   : > { %1753 = vmatpush1.msra.mxu0 %v1539_v39  ;;  %v1567_v39 = vunpack.c.l.bf16 %v1418_v40 }
 0x17d   : > { %1754 = vmatprep.subr.mxu0 %v1538_v41  ;;  %v1566_v41 = vunpack.c.h.bf16 %v1417_v30 }
 0x17e   : > { %1755 = vmatpush1.msra.mxu0 %v1537_v43  ;;  %v1565_v43 = vunpack.c.l.bf16 %v1417_v30  ;;  %v1433_v30 = vld [vmem:[#allocation5 + $0x220] sm:$0xff] }
 0x17f   : > { %1756 = vmatprep.subr.mxu0 %v1536_v44  ;;  %v1564_v44 = vunpack.c.h.bf16 %v1416_v7 }
 0x180   : > { %1757 = vmatpush1.msra.mxu0 %v1535_v17  ;;  %v1563_v17 = vunpack.c.l.bf16 %v1416_v7  ;;  %v1432_v7 = vld [vmem:[#allocation5 + $0x218] sm:$0xff] }
 0x181   : > { %1758 = vmatprep.subr.mxu0 %v1534_v49  ;;  %v1562_v49 = vunpack.c.h.bf16 %v1415_v60 }
 0x182   : > { %1759 = vmatpush1.msra.mxu0 %v1533_v20  ;;  %v1561_v20 = vunpack.c.l.bf16 %v1415_v60  ;;  %v1431_v60 = vld [vmem:[#allocation5 + $0x210] sm:$0xff] }
 0x183   : > { %1760 = vmatprep.subr.mxu0 %v1532_v46  ;;  %v1560_v46 = vunpack.c.h.bf16 %v1414_v47 }
 0x184   : > { %1761 = vmatpush1.msra.mxu0 %v1531_v51  ;;  %v1559_v51 = vunpack.c.l.bf16 %v1414_v47  ;;  %v735_v47 = vsub.s32 5, %v2960_v24 }
 0x185   : > { %1762 = vmatprep.subr.mxu0 %v1530_v53  ;;  %v1557_v53 = vunpack.c.l.bf16 %v1413_v23  ;;  %v1593_v23 = vunpack.c.l.bf16 %v1431_v60 }
 0x186   : > { %1763 = vmatpush1.msra.mxu0 %v1529_v34  ;;  %v719_v34 = vsub.s32 1, %v2960_v24 }
 0x187   : > { %1764 = vmatprep.subr.mxu0 %v1528_v57  ;;  %v3197_v57 = vld [vmem:[%s3475_s3] sm:$0x3f] }
 0x188   : > { %1765 = vmatpush1.msra.mxu0 %v1527_v19  ;;  %v720_v19 = vrot.slane %v3197_v57, %v719_v34  ;;  %v716_v50 = vrot.slane %v3197_v57, %v715_v56 }
 0x189   : > { %1766 = vmatprep.subr.mxu0 %v1526_v59 }
 0x18a   : > { %1767 = vmatpush1.msra.mxu0 %v1525_v13  ;;  %v1443_v13 = vld [vmem:[#allocation5 + $0x270] sm:$0xff] }
 0x18b   : > { %1768 = vmatprep.subr.mxu0 %v1588_v58  ;;  %v1617_v18 = vunpack.c.l.bf16 %v1443_v13 }
 0x18c   : > { %1769 = vmatpush2.msra.mxu0 %v1587_v62  ;;  %v1619_v62 = vunpack.c.l.bf16 %v3189_v5  ;;  %v1609_v5 = vunpack.c.l.bf16 %v1439_v25 }
 0x18d   : > { %1770 = vmatprep.subr.mxu0 %v1586_v42 }
 0x18e   : > { %1771 = vmatpush2.msra.mxu0 %v1585_v63  ;;  %v1618_v63 = vunpack.c.h.bf16 %v1443_v13 }
 0x18f   : > { %1772 = vmatprep.subr.mxu0 %v1584_v31  ;;  %v1615_v31 = vunpack.c.l.bf16 %v1442_v37 }
 0x190   : > { %1773 = vmatpush2.msra.mxu0 %v1583_v32  ;;  %v1614_v32 = vunpack.c.h.bf16 %v1441_v29 }
 0x191   : > { %1774 = vmatprep.subr.mxu0 %v1582_v9  ;;  %v1611_v9 = vunpack.c.l.bf16 %v1440_v2 }
 0x192   : > { %1775 = vmatpush2.msra.mxu0 %v1581_v10  ;;  %v723_v10 = vsub.s32 2, %v2960_v24 }
 0x193   : > { %1776 = vmatprep.subr.mxu0 %v1580_v15  ;;  %v1437_v15 = vld [vmem:[#allocation5 + $0x240] sm:$0xff] }
 0x194   : > { %1777 = vmatpush2.msra.mxu0 %v1579_v21  ;;  %v728_v21 = vrot.slane %v3197_v57, %v727_v45 }
 0x195   : > { %1778 = vmatprep.subr.mxu0 %v1578_v6  ;;  %v1436_v6 = vld [vmem:[#allocation5 + $0x238] sm:$0xff] }
 0x196   : > { %1779 = vmatpush2.msra.mxu0 %v1577_v11  ;;  %v724_v11 = vrot.slane %v3197_v57, %v723_v10 }
 0x197   : > { %1780 = vmatprep.subr.mxu0 %v1576_v22  ;;  %v1606_v22 = vunpack.c.h.bf16 %v1437_v15 }
 0x198   : > { %1781 = vmatpush2.msra.mxu0 %v1575_v54  ;;  %v1605_v54 = vunpack.c.l.bf16 %v1437_v15  ;;  %v1640_v15 = vunpack.c.h.bf16 %v1454_v14 }
 0x199   : > { %1782 = vmatprep.subr.mxu0 %v1574_v28 }
 0x19a   : > { %1783 = vmatpush2.msra.mxu0 %v1573_v33  ;;  %v1604_v33 = vunpack.c.h.bf16 %v1436_v6 }
 0x19b   : > { %1784 = vmatprep.subr.mxu0 %v1572_v35  ;;  %v1603_v35 = vunpack.c.l.bf16 %v1436_v6 }
 0x19c   : > { %1785 = vmatpush2.msra.mxu0 %v1571_v55  ;;  %v1434_v55 = vld [vmem:[#allocation5 + $0x228] sm:$0xff] }
 0x19d   : > { %1786 = vmatprep.subr.mxu0 %v1570_v36  ;;  %v1602_v36 = vunpack.c.h.bf16 %v1435_v8 }
 0x19e   : > { %1787 = vmatpush2.msra.mxu0 %v1569_v27  ;;  %v1601_v27 = vunpack.c.l.bf16 %v1435_v8 }
 0x19f   : > { %1788 = vmatprep.subr.mxu0 %v1568_v38  ;;  %v1600_v38 = vunpack.c.h.bf16 %v1434_v55 }
 0x1a0   : > { %1789 = vmatpush2.msra.mxu0 %v1567_v39  ;;  %v1599_v39 = vunpack.c.l.bf16 %v1434_v55  ;;  %v1448_v55 = vld [vmem:[#allocation5 + $0x298] sm:$0xff] }
 0x1a1   : > { %1790 = vmatprep.subr.mxu0 %v1566_v41  ;;  %v1598_v41 = vunpack.c.h.bf16 %v1433_v30 }
 0x1a2   : > { %1791 = vmatpush2.msra.mxu0 %v1565_v43  ;;  %v1597_v43 = vunpack.c.l.bf16 %v1433_v30  ;;  %v1628_v30 = vunpack.c.h.bf16 %v1448_v55 }
 0x1a3   : > { %1792 = vmatprep.subr.mxu0 %v1564_v44  ;;  %v1596_v44 = vunpack.c.h.bf16 %v1432_v7 }
 0x1a4   : > { %1793 = vmatpush2.msra.mxu0 %v1563_v17  ;;  %v1595_v17 = vunpack.c.l.bf16 %v1432_v7  ;;  %v731_v7 = vsub.s32 4, %v2960_v24 }
 0x1a5   : > { %1794 = vmatprep.subr.mxu0 %v1562_v49  ;;  %v1430_v49 = vld [vmem:[#allocation5 + $0x208] sm:$0xff] }
 0x1a6   : > { %1795 = vmatpush2.msra.mxu0 %v1561_v20  ;;  %v1594_v20 = vunpack.c.h.bf16 %v1431_v60  ;;  %v1445_v60 = vld [vmem:[#allocation5 + $0x280] sm:$0xff] }
 0x1a7   : > { %1796 = vmatprep.subr.mxu0 %v1560_v46  ;;  %v1429_v46 = vld [vmem:[#allocation5 + $0x200] sm:$0xff] }
 0x1a8   : > { %1797 = vmatpush2.msra.mxu0 %v1559_v51  ;;  %v1592_v51 = vunpack.c.h.bf16 %v1430_v49  ;;  %v1589_v13 = vunpack.c.l.bf16 %v1429_v46 }
 0x1a9   : > { %1798 = vmatprep.subr.mxu0 %v1558_v52  ;;  %v736_v52 = vrot.slane %v3197_v57, %v735_v47  ;;  %v732_v47 = vrot.slane %v3197_v57, %v731_v7 }
 0x1aa   : > { %1799 = vmatpush2.msra.mxu0 %v1557_v53  ;;  %v1591_v53 = vunpack.c.l.bf16 %v1430_v49  ;;  %v1622_v49 = vunpack.c.h.bf16 %v1445_v60 }
 0x20b   : > { %v1218_v59 = vpop.f32.mrf.mxu0 }
 0x20c   : > { %v1219_v42 = vadd.f32 %v1218_v59, %v716_v50  ;;  %v1590_v59 = vunpack.c.h.bf16 %v1429_v46  ;;  %v1653_v46 = vld [vmem:[%s3477_s5] sm:$0x3] }
 0x20d   : > { %v1220_v61 = vpop.f32.mrf.mxu0 }
 0x20e   : > { %v1221_v58 = vadd.f32 %v1220_v61, %v720_v19  ;;  %v1460_v19 = vld [vmem:[#allocation5 + $0x2f8] sm:$0xff]  ;;  %v1459_v61 = vld [vmem:[#allocation5 + $0x2f0] sm:$0xff] }
 0x20f   : > { %v1649_v29 = vunpack.c.l.bf16 %v1459_v61 }
 0x210   : > { %1729 = vmatprep.mubr.f32.mxu1 %v1221_v58 }
 0x211   : > { %1730 = vmatmul.mubr.f32.vlgmr.msra.gmra.mxu1 %v1219_v42  ;;  %v1651_v42 = vunpack.c.l.bf16 %v1460_v19 }
 0x212   : > { %1808 = vmatpush1.msra.mxu1 %v1619_v62  ;;  %v1652_v62 = vunpack.c.h.bf16 %v1460_v19 }
 0x213   : > { %1809 = vmatprep.subr.mxu1 %v1618_v63  ;;  %v1458_v63 = vld [vmem:[#allocation5 + $0x2e8] sm:$0xff] }
 0x214   : > { %1810 = vmatpush1.msra.mxu1 %v1617_v18  ;;  %v1650_v18 = vunpack.c.h.bf16 %v1459_v61  ;;  %v1647_v2 = vunpack.c.l.bf16 %v1458_v63 }
 0x215   : > { %1811 = vmatprep.subr.mxu1 %v1616_v1  ;;  %v1457_v1 = vld [vmem:[#allocation5 + $0x2e0] sm:$0xff] }
 0x216   : > { %1812 = vmatpush1.msra.mxu1 %v1615_v31  ;;  %v1648_v31 = vunpack.c.h.bf16 %v1458_v63  ;;  %v1645_v25 = vunpack.c.l.bf16 %v1457_v1 }
 0x217   : > { %1813 = vmatprep.subr.mxu1 %v1614_v32  ;;  %v1456_v32 = vld [vmem:[#allocation5 + $0x2d8] sm:$0xff] }
 0x218   : > { %1814 = vmatpush1.msra.mxu1 %v1613_v4  ;;  %v1646_v4 = vunpack.c.h.bf16 %v1457_v1  ;;  %v1643_v45 = vunpack.c.l.bf16 %v1456_v32 }
 0x219   : > { %1815 = vmatprep.subr.mxu1 %v1612_v0  ;;  %v1455_v0 = vld [vmem:[#allocation5 + $0x2d0] sm:$0xff] }
 0x21a   : > { %1816 = vmatpush1.msra.mxu1 %v1611_v9  ;;  %v1644_v9 = vunpack.c.h.bf16 %v1456_v32  ;;  %v1642_v10 = vunpack.c.h.bf16 %v1455_v0 }
 0x21b   : > { %v1289_v3 = vpop.f32.mrf.mxu0  ;;  %1817 = vmatprep.subr.mxu1 %v1610_v16  ;;  %v1641_v16 = vunpack.c.l.bf16 %v1455_v0 }
 0x21c   : > { %1818 = vmatpush1.msra.mxu1 %v1609_v5  ;;  %v1290_v40 = vadd.f32 %v1289_v3, %v724_v11  ;;  %v1453_v5 = vld [vmem:[#allocation5 + $0x2c0] sm:$0xff]  ;;  %v1451_v11 = vld [vmem:[#allocation5 + $0x2b0] sm:$0xff] }
 0x21d   : > { %v1291_v28 = vpop.f32.mrf.mxu0  ;;  %1819 = vmatprep.subr.mxu1 %v1608_v12  ;;  %v1639_v12 = vunpack.c.l.bf16 %v1454_v14  ;;  %v1637_v6 = vunpack.c.l.bf16 %v1453_v5  ;;  %v1634_v8 = vunpack.c.h.bf16 %v1451_v11 }
 0x21e   : > { %v1292_v26 = vadd.f32 %v1291_v28, %v728_v21  ;;  %1820 = vmatpush1.msra.mxu1 %v1607_v48  ;;  %v1452_v21 = vld [vmem:[#allocation5 + $0x2b8] sm:$0xff]  ;;  %v1638_v48 = vunpack.c.h.bf16 %v1453_v5  ;;  %v1633_v28 = vunpack.c.l.bf16 %v1451_v11 }
 0x21f   : > { %1821 = vmatprep.subr.mxu1 %v1606_v22  ;;  %v1636_v3 = vunpack.c.h.bf16 %v1452_v21  ;;  %v1635_v22 = vunpack.c.l.bf16 %v1452_v21 }
 0x220   : > { %1800 = vmatprep.mubr.f32.mxu0 %v1292_v26  ;;  %1822 = vmatpush1.msra.mxu1 %v1605_v54  ;;  %v1450_v54 = vld [vmem:[#allocation5 + $0x2a8] sm:$0xff] }
 0x221   : > { %1801 = vmatmul.mubr.f32.vlgmr.msra.gmra.mxu0 %v1290_v40  ;;  %1823 = vmatprep.subr.mxu1 %v1604_v33  ;;  %v1449_v33 = vld [vmem:[#allocation5 + $0x2a0] sm:$0xff]  ;;  %v1632_v26 = vunpack.c.h.bf16 %v1450_v54 }
 0x222   : > { %1824 = vmatpush1.msra.mxu1 %v1603_v35  ;;  %v1631_v35 = vunpack.c.l.bf16 %v1450_v54  ;;  %v1630_v40 = vunpack.c.h.bf16 %v1449_v33 }
 0x223   : > { %1825 = vmatprep.subr.mxu1 %v1602_v36  ;;  %v1629_v36 = vunpack.c.l.bf16 %v1449_v33 }
 0x224   : > { %1826 = vmatpush1.msra.mxu1 %v1601_v27  ;;  %v1447_v27 = vld [vmem:[#allocation5 + $0x290] sm:$0xff] }
 0x225   : > { %1827 = vmatprep.subr.mxu1 %v1600_v38  ;;  %v1627_v38 = vunpack.c.l.bf16 %v1448_v55 }
 0x226   : > { %1828 = vmatpush1.msra.mxu1 %v1599_v39  ;;  %v1446_v39 = vld [vmem:[#allocation5 + $0x288] sm:$0xff] }
 0x227   : > { %1829 = vmatprep.subr.mxu1 %v1598_v41  ;;  %v1626_v41 = vunpack.c.h.bf16 %v1447_v27 }
 0x228   : > { %1830 = vmatpush1.msra.mxu1 %v1597_v43  ;;  %v1625_v43 = vunpack.c.l.bf16 %v1447_v27 }
 0x229   : > { %1831 = vmatprep.subr.mxu1 %v1596_v44  ;;  %v1624_v44 = vunpack.c.h.bf16 %v1446_v39 }
 0x22a   : > { %1832 = vmatpush1.msra.mxu1 %v1595_v17  ;;  %v1623_v17 = vunpack.c.l.bf16 %v1446_v39 }
 0x22b   : > { %v3212_v50 = vpop.f32.mrf.mxu0  ;;  %1833 = vmatprep.subr.mxu1 %v1594_v20  ;;  %v1621_v20 = vunpack.c.l.bf16 %v1445_v60 }
 0x22c   : > { %1834 = vmatpush1.msra.mxu1 %v1593_v23  ;;  %v1361_v23 = vadd.f32 %v3212_v50, %v732_v47 }
 0x22d   : > { %v1362_v58 = vpop.f32.mrf.mxu0  ;;  %1835 = vmatprep.subr.mxu1 %v1592_v51 }
 0x22e   : > { %v1363_v37 = vadd.f32 %v1362_v58, %v736_v52  ;;  %1836 = vmatpush1.msra.mxu1 %v1591_v53  ;;  %v1658_v52 = vrot.slane %v1653_v46, %v715_v56  ;;  %v1662_v53 = vrot.slane %v1653_v46, %v719_v34 }
 0x22f   : > { %1837 = vmatprep.subr.mxu1 %v1590_v59 }
 0x230   : > { %1838 = vmatpush1.msra.mxu1 %v1589_v13  ;;  %1871 = vmatprep.mubr.f32.mxu1 %v1363_v37 }
 0x231   : > { %1839 = vmatprep.subr.mxu1 %v1652_v62 }
 0x232   : > { %1840 = vmatpush2.msra.mxu1 %v1651_v42 }
 0x233   : > { %1841 = vmatprep.subr.mxu1 %v1650_v18 }
 0x234   : > { %1842 = vmatpush2.msra.mxu1 %v1649_v29 }
 0x235   : > { %1843 = vmatprep.subr.mxu1 %v1648_v31 }
 0x236   : > { %1844 = vmatpush2.msra.mxu1 %v1647_v2 }
 0x237   : > { %1845 = vmatprep.subr.mxu1 %v1646_v4 }
 0x238   : > { %1846 = vmatpush2.msra.mxu1 %v1645_v25 }
 0x239   : > { %1847 = vmatprep.subr.mxu1 %v1644_v9 }
 0x23a   : > { %1848 = vmatpush2.msra.mxu1 %v1643_v45 }
 0x23b   : > { %1849 = vmatprep.subr.mxu1 %v1642_v10 }
 0x23c   : > { %1850 = vmatpush2.msra.mxu1 %v1641_v16 }
 0x23d   : > { %1851 = vmatprep.subr.mxu1 %v1640_v15 }
 0x23e   : > { %1852 = vmatpush2.msra.mxu1 %v1639_v12 }
 0x23f   : > { %1853 = vmatprep.subr.mxu1 %v1638_v48 }
 0x240   : > { %1854 = vmatpush2.msra.mxu1 %v1637_v6 }
 0x241   : > { %1855 = vmatprep.subr.mxu1 %v1636_v3 }
 0x242   : > { %1856 = vmatpush2.msra.mxu1 %v1635_v22 }
 0x243   : > { %1857 = vmatprep.subr.mxu1 %v1634_v8 }
 0x244   : > { %1858 = vmatpush2.msra.mxu1 %v1633_v28 }
 0x245   : > { %1859 = vmatprep.subr.mxu1 %v1632_v26 }
 0x246   : > { %1860 = vmatpush2.msra.mxu1 %v1631_v35 }
 0x247   : > { %1861 = vmatprep.subr.mxu1 %v1630_v40 }
 0x248   : > { %1862 = vmatpush2.msra.mxu1 %v1629_v36 }
 0x249   : > { %1863 = vmatprep.subr.mxu1 %v1628_v30 }
 0x24a   : > { %1864 = vmatpush2.msra.mxu1 %v1627_v38 }
 0x24b   : > { %1865 = vmatprep.subr.mxu1 %v1626_v41 }
 0x24c   : > { %1866 = vmatpush2.msra.mxu1 %v1625_v43 }
 0x24d   : > { %1867 = vmatprep.subr.mxu1 %v1624_v44 }
 0x24e   : > { %1868 = vmatpush2.msra.mxu1 %v1623_v17 }
 0x24f   : > { %1869 = vmatprep.subr.mxu1 %v1622_v49 }
 0x250   : > { %1870 = vmatpush2.msra.mxu1 %v1621_v20 }
 0x251   : > { %1872 = vmatmul.mubr.f32.vlgmr.msra.gmra.mxu1 %v1361_v23 }
 0x2d1   : > { %v1731_v51 = vpop.f32.mrf.mxu1 }
 0x2d2   : > { %v1732_v59 = vadd.f32 %v1731_v51, %v1658_v52 }
 0x2d3   : > { %v1733_v19 = vpop.f32.mrf.mxu1 }
 0x2d4   : > { %v1734_v61 = vadd.f32 %v1733_v19, %v1662_v53 }
 0x2e1   : > { %v1802_v57 = vpop.f32.mrf.mxu0 }
 0x2e2   : > { %v1803_v50 = vadd.f32 %v1802_v57, %v1732_v59 }
 0x2e3   : > { %v1804_v13 = vpop.f32.mrf.mxu0 }
 0x2e4   : > { %v1805_v62 = vadd.f32 %v1804_v13, %v1734_v61 }
 0x311   : > { %v1873_v58 = vpop.f32.mrf.mxu1 }
 0x312   : > { %v1874_v37 = vadd.f32 %v1873_v58, %v1803_v50 }
 0x313   : > { %v1875_v42 = vpop.f32.mrf.mxu1 }
 0x314   : > { %v1876_v63 = vadd.f32 %v1875_v42, %v1805_v62  ;;  %v1878_v18 = vmul.f32 %v1874_v37, %v1874_v37 }
 0x316   : > { %v1879_v29 = vmul.f32 %v1876_v63, %v1876_v63 }
 0x318   : > { %v1880_v1 = vadd.f32 %v1879_v29, %v1878_v18 }
 0x31a   : > { %1881 = vadd.xlane.f32.xlu0 %v1880_v1 }
 0x3a3   : > { %v1882_v56 = vpop.xlane.xlu0 %1881 }
 0x3a4   : > { %v1884_v31 = vmax.f32 %v1882_v56, 1e-24  ;;  %vm1883_vm0 = vcmp.gt.f32.partialorder %v1882_v56, 1e-24 }
 0x3a6   : > { %2426 = vrsqrt.f32 %v1884_v31 }
 0x3b3   : > { %v2427_v24 = vpop.eup %2426 }
 0x3b4   : > { %v1886_v34 = vsel %vm1883_vm0, %v2427_v24, 1e+12 }
 0x3b5   : > { %v1887_v2 = vmul.f32 %v1886_v34, %v1874_v37  ;;  %v1888_v32 = vmul.f32 %v1886_v34, %v1876_v63 }
 0x3b7   : > { %1889 = vst [vmem:[%s2698_s22] sm:$0xff] %v1887_v2  ;;  %1890 = vst [vmem:[%s2698_s22 + $0x8] sm:$0xff] %v1888_v32 }
 0x3b8 PF: > { %p2354_p13 = scmp.ne.s32.totalorder %s2626_s9, 1 }
 0x3ba   : > { %1894 = sbr.rel (%p2354_p13) target bundleno = 1388 (0x56c), region = 68 }
 0x3bf   : > { %v1914_v4 = vld [vmem:[%s3478_s6 + $0x78] sm:$0xff]  ;;  %v1913_v0 = vld [vmem:[%s3478_s6 + $0x70] sm:$0xff]  ;;  %v1912_v5 = vld [vmem:[%s3478_s6 + $0x68] sm:$0xff] }
 0x3c0   : > { %v1946_v25 = vld [vmem:[%s3478_s6 + $0x178] sm:$0xff]  ;;  %v1994_v9 = vunpack.c.h.bf16 %v1914_v4  ;;  %v1993_v14 = vunpack.c.l.bf16 %v1914_v4  ;;  %v1945_v16 = vld [vmem:[%s3478_s6 + $0x170] sm:$0xff]  ;;  %v1944_v15 = vld [vmem:[%s3478_s6 + $0x168] sm:$0xff]  ;;  %v1992_v12 = vunpack.c.h.bf16 %v1913_v0  ;;  %v1991_v48 = vunpack.c.l.bf16 %v1913_v0 }
 0x3c1   : > { %v2058_v45 = vunpack.c.h.bf16 %v1946_v25  ;;  %v2057_v10 = vunpack.c.l.bf16 %v1946_v25  ;;  %v2056_v21 = vunpack.c.h.bf16 %v1945_v16  ;;  %v2055_v6 = vunpack.c.l.bf16 %v1945_v16  ;;  %v1911_v11 = vld [vmem:[%s3478_s6 + $0x60] sm:$0xff]  ;;  %v1910_v33 = vld [vmem:[%s3478_s6 + $0x58] sm:$0xff]  ;;  %v1909_v27 = vld [vmem:[%s3478_s6 + $0x50] sm:$0xff] }
 0x3c2   : > { %v1943_v3 = vld [vmem:[%s3478_s6 + $0x160] sm:$0xff]  ;;  %2103 = vmatprep.subr.mxu0 %v1994_v9  ;;  %v1990_v22 = vunpack.c.h.bf16 %v1912_v5  ;;  %v2054_v54 = vunpack.c.h.bf16 %v1944_v15  ;;  %v1989_v8 = vunpack.c.l.bf16 %v1912_v5  ;;  %v2053_v28 = vunpack.c.l.bf16 %v1944_v15  ;;  %v1942_v26 = vld [vmem:[%s3478_s6 + $0x158] sm:$0xff]  ;;  %v1941_v30 = vld [vmem:[%s3478_s6 + $0x150] sm:$0xff] }
 0x3c3   : > { %2174 = vmatprep.subr.mxu1 %v2058_v45  ;;  %2104 = vmatpush1.msra.mxu0 %v1993_v14  ;;  %v1988_v35 = vunpack.c.h.bf16 %v1911_v11  ;;  %v2052_v55 = vunpack.c.h.bf16 %v1943_v3  ;;  %v1987_v40 = vunpack.c.l.bf16 %v1911_v11  ;;  %v2051_v36 = vunpack.c.l.bf16 %v1943_v3  ;;  %v1908_v43 = vld [vmem:[%s3478_s6 + $0x48] sm:$0xff]  ;;  %v1907_v20 = vld [vmem:[%s3478_s6 + $0x40] sm:$0xff]  ;;  %v1906_v53 = vld [vmem:[%s3478_s6 + $0x38] sm:$0xff] }
 0x3c4   : > { %2175 = vmatpush1.msra.mxu1 %v2057_v10  ;;  %2105 = vmatprep.subr.mxu0 %v1992_v12  ;;  %v1986_v38 = vunpack.c.h.bf16 %v1910_v33  ;;  %v2050_v39 = vunpack.c.h.bf16 %v1942_v26  ;;  %v1985_v7 = vunpack.c.l.bf16 %v1910_v33  ;;  %v2049_v41 = vunpack.c.l.bf16 %v1942_v26  ;;  %v1940_v60 = vld [vmem:[%s3478_s6 + $0x148] sm:$0xff]  ;;  %v1939_v23 = vld [vmem:[%s3478_s6 + $0x140] sm:$0xff]  ;;  %v1938_v19 = vld [vmem:[%s3478_s6 + $0x138] sm:$0xff] }
 0x3c5   : > { %2176 = vmatprep.subr.mxu1 %v2056_v21  ;;  %2106 = vmatpush1.msra.mxu0 %v1991_v48  ;;  %v1984_v44 = vunpack.c.h.bf16 %v1909_v27  ;;  %v2048_v17 = vunpack.c.h.bf16 %v1941_v30  ;;  %v1983_v47 = vunpack.c.l.bf16 %v1909_v27  ;;  %v2047_v49 = vunpack.c.l.bf16 %v1941_v30  ;;  %v1905_v58 = vld [vmem:[%s3478_s6 + $0x30] sm:$0xff]  ;;  %v1904_v29 = vld [vmem:[%s3478_s6 + $0x28] sm:$0xff]  ;;  %v1903_v2 = vld [vmem:[%s3478_s6 + $0x20] sm:$0xff] }
 0x3c6   : > { %2177 = vmatpush1.msra.mxu1 %v2055_v6  ;;  %2107 = vmatprep.subr.mxu0 %v1990_v22  ;;  %v1982_v46 = vunpack.c.h.bf16 %v1908_v43  ;;  %v2046_v51 = vunpack.c.h.bf16 %v1940_v60  ;;  %v1981_v52 = vunpack.c.l.bf16 %v1908_v43  ;;  %v2045_v57 = vunpack.c.l.bf16 %v1940_v60  ;;  %v1937_v62 = vld [vmem:[%s3478_s6 + $0x130] sm:$0xff]  ;;  %v1936_v1 = vld [vmem:[%s3478_s6 + $0x128] sm:$0xff]  ;;  %v1935_v32 = vld [vmem:[%s3478_s6 + $0x120] sm:$0xff] }
 0x3c7   : > { %2178 = vmatprep.subr.mxu1 %v2054_v54  ;;  %2108 = vmatpush1.msra.mxu0 %v1989_v8  ;;  %v1980_v59 = vunpack.c.h.bf16 %v1907_v20  ;;  %v2044_v13 = vunpack.c.h.bf16 %v1939_v23  ;;  %v1979_v61 = vunpack.c.l.bf16 %v1907_v20  ;;  %v2043_v50 = vunpack.c.l.bf16 %v1939_v23  ;;  %v1902_v45 = vld [vmem:[%s3478_s6 + $0x18] sm:$0xff]  ;;  %v1901_v12 = vld [vmem:[%s3478_s6 + $0x10] sm:$0xff]  ;;  %v1900_v22 = vld [vmem:[%s3478_s6 + $0x8] sm:$0xff] }
 0x3c8   : > { %2179 = vmatpush1.msra.mxu1 %v2053_v28  ;;  %2109 = vmatprep.subr.mxu0 %v1988_v35  ;;  %v1978_v37 = vunpack.c.h.bf16 %v1906_v53  ;;  %v2042_v42 = vunpack.c.h.bf16 %v1938_v19  ;;  %v1977_v63 = vunpack.c.l.bf16 %v1906_v53  ;;  %v2041_v18 = vunpack.c.l.bf16 %v1938_v19  ;;  %v1934_v14 = vld [vmem:[%s3478_s6 + $0x118] sm:$0xff]  ;;  %v1933_v21 = vld [vmem:[%s3478_s6 + $0x110] sm:$0xff]  ;;  %v1932_v54 = vld [vmem:[%s3478_s6 + $0x108] sm:$0xff] }
 0x3c9   : > { %2180 = vmatprep.subr.mxu1 %v2052_v55  ;;  %2110 = vmatpush1.msra.mxu0 %v1987_v40  ;;  %v1976_v56 = vunpack.c.h.bf16 %v1905_v58  ;;  %v2040_v31 = vunpack.c.h.bf16 %v1937_v62  ;;  %v1975_v24 = vunpack.c.l.bf16 %v1905_v58  ;;  %v2039_v34 = vunpack.c.l.bf16 %v1937_v62  ;;  %v1899_v35 = vld [vmem:[%s3478_s6] sm:$0xff] }
 0x3ca   : > { %2181 = vmatpush1.msra.mxu1 %v2051_v36  ;;  %2111 = vmatprep.subr.mxu0 %v1986_v38  ;;  %v1974_v4 = vunpack.c.h.bf16 %v1904_v29  ;;  %v2038_v25 = vunpack.c.h.bf16 %v1936_v1  ;;  %v1973_v0 = vunpack.c.l.bf16 %v1904_v29  ;;  %v2037_v9 = vunpack.c.l.bf16 %v1936_v1  ;;  %v1931_v55 = vld [vmem:[%s3478_s6 + $0x100] sm:$0xff]  ;;  %v1930_v38 = vld [vmem:[%s3478_s6 + $0xf8] sm:$0xff] }
 0x3cb   : > { %2182 = vmatprep.subr.mxu1 %v2050_v39  ;;  %2112 = vmatpush1.msra.mxu0 %v1985_v7  ;;  %v1972_v10 = vunpack.c.h.bf16 %v1903_v2  ;;  %v2036_v16 = vunpack.c.h.bf16 %v1935_v32  ;;  %v1971_v5 = vunpack.c.l.bf16 %v1903_v2  ;;  %v2035_v15 = vunpack.c.l.bf16 %v1935_v32  ;;  %v1962_v39 = vld [vmem:[%s3478_s6 + $0x1f8] sm:$0xff] }
 0x3cc   : > { %2183 = vmatpush1.msra.mxu1 %v2049_v41  ;;  %2113 = vmatprep.subr.mxu0 %v1984_v44  ;;  %v1970_v48 = vunpack.c.h.bf16 %v1902_v45  ;;  %v2034_v6 = vunpack.c.h.bf16 %v1934_v14  ;;  %v1969_v11 = vunpack.c.l.bf16 %v1902_v45  ;;  %v2033_v3 = vunpack.c.l.bf16 %v1934_v14  ;;  %v1929_v44 = vld [vmem:[%s3478_s6 + $0xf0] sm:$0xff] }
 0x3cd   : > { %2184 = vmatprep.subr.mxu1 %v2048_v17  ;;  %2114 = vmatpush1.msra.mxu0 %v1983_v47  ;;  %v1968_v8 = vunpack.c.h.bf16 %v1901_v12  ;;  %v2032_v28 = vunpack.c.h.bf16 %v1933_v21  ;;  %v1967_v33 = vunpack.c.l.bf16 %v1901_v12  ;;  %v2031_v26 = vunpack.c.l.bf16 %v1933_v21  ;;  %v1961_v17 = vld [vmem:[%s3478_s6 + $0x1f0] sm:$0xff] }
 0x3ce   : > { %2185 = vmatpush1.msra.mxu1 %v2047_v49  ;;  %2115 = vmatprep.subr.mxu0 %v1982_v46  ;;  %v1966_v40 = vunpack.c.h.bf16 %v1900_v22  ;;  %v2030_v36 = vunpack.c.h.bf16 %v1932_v54  ;;  %v1965_v27 = vunpack.c.l.bf16 %v1900_v22  ;;  %v2029_v30 = vunpack.c.l.bf16 %v1932_v54  ;;  %v1928_v46 = vld [vmem:[%s3478_s6 + $0xe8] sm:$0xff] }
 0x3cf   : > { %2186 = vmatprep.subr.mxu1 %v2046_v51  ;;  %2116 = vmatpush1.msra.mxu0 %v1981_v52  ;;  %v1964_v7 = vunpack.c.h.bf16 %v1899_v35  ;;  %v2028_v41 = vunpack.c.h.bf16 %v1931_v55  ;;  %v1963_v43 = vunpack.c.l.bf16 %v1899_v35  ;;  %v2027_v60 = vunpack.c.l.bf16 %v1931_v55  ;;  %v1960_v51 = vld [vmem:[%s3478_s6 + $0x1e8] sm:$0xff] }
 0x3d0   : > { %2187 = vmatpush1.msra.mxu1 %v2045_v57  ;;  %2117 = vmatprep.subr.mxu0 %v1980_v59  ;;  %v2026_v47 = vunpack.c.h.bf16 %v1930_v38  ;;  %v2090_v49 = vunpack.c.h.bf16 %v1962_v39  ;;  %v2025_v20 = vunpack.c.l.bf16 %v1930_v38  ;;  %v2089_v23 = vunpack.c.l.bf16 %v1962_v39  ;;  %v1927_v59 = vld [vmem:[%s3478_s6 + $0xe0] sm:$0xff] }
 0x3d1   : > { %2188 = vmatprep.subr.mxu1 %v2044_v13  ;;  %2118 = vmatpush1.msra.mxu0 %v1979_v61  ;;  %v2024_v52 = vunpack.c.h.bf16 %v1929_v44  ;;  %v2088_v57 = vunpack.c.h.bf16 %v1961_v17  ;;  %v2023_v53 = vunpack.c.l.bf16 %v1929_v44  ;;  %v2087_v19 = vunpack.c.l.bf16 %v1961_v17  ;;  %v1959_v13 = vld [vmem:[%s3478_s6 + $0x1e0] sm:$0xff] }
 0x3d2   : > { %2189 = vmatpush1.msra.mxu1 %v2043_v50  ;;  %2119 = vmatprep.subr.mxu0 %v1978_v37  ;;  %v2022_v61 = vunpack.c.h.bf16 %v1928_v46  ;;  %v2086_v50 = vunpack.c.h.bf16 %v1960_v51  ;;  %v2021_v58 = vunpack.c.l.bf16 %v1928_v46  ;;  %v2085_v62 = vunpack.c.l.bf16 %v1960_v51  ;;  %v1926_v37 = vld [vmem:[%s3478_s6 + $0xd8] sm:$0xff] }
 0x3d3   : > { %2190 = vmatprep.subr.mxu1 %v2042_v42  ;;  %2120 = vmatpush1.msra.mxu0 %v1977_v63  ;;  %v1958_v42 = vld [vmem:[%s3478_s6 + $0x1d8] sm:$0xff]  ;;  %v2020_v63 = vunpack.c.h.bf16 %v1927_v59  ;;  %v2019_v29 = vunpack.c.l.bf16 %v1927_v59  ;;  %v2083_v1 = vunpack.c.l.bf16 %v1959_v13  ;;  %v2017_v2 = vunpack.c.l.bf16 %v1926_v37 }
 0x3d4   : > { %2191 = vmatpush1.msra.mxu1 %v2041_v18  ;;  %2121 = vmatprep.subr.mxu0 %v1976_v56  ;;  %v2084_v18 = vunpack.c.h.bf16 %v1959_v13  ;;  %v1925_v56 = vld [vmem:[%s3478_s6 + $0xd0] sm:$0xff]  ;;  %v2081_v32 = vunpack.c.l.bf16 %v1958_v42 }
 0x3d5   : > { %2192 = vmatprep.subr.mxu1 %v2040_v31  ;;  %2122 = vmatpush1.msra.mxu0 %v1975_v24  ;;  %v1957_v31 = vld [vmem:[%s3478_s6 + $0x1d0] sm:$0xff]  ;;  %v2018_v24 = vunpack.c.h.bf16 %v1926_v37  ;;  %v2015_v45 = vunpack.c.l.bf16 %v1925_v56 }
 0x3d6   : > { %2193 = vmatpush1.msra.mxu1 %v2039_v34  ;;  %2123 = vmatprep.subr.mxu0 %v1974_v4  ;;  %v2082_v34 = vunpack.c.h.bf16 %v1958_v42  ;;  %v1924_v4 = vld [vmem:[%s3478_s6 + $0xc8] sm:$0xff]  ;;  %v2079_v14 = vunpack.c.l.bf16 %v1957_v31 }
 0x3d7   : > { %2194 = vmatprep.subr.mxu1 %v2038_v25  ;;  %2124 = vmatpush1.msra.mxu0 %v1973_v0  ;;  %v1956_v25 = vld [vmem:[%s3478_s6 + $0x1c8] sm:$0xff]  ;;  %v2016_v0 = vunpack.c.h.bf16 %v1925_v56  ;;  %v2013_v12 = vunpack.c.l.bf16 %v1924_v4 }
 0x3d8   : > { %2195 = vmatpush1.msra.mxu1 %v2037_v9  ;;  %2125 = vmatprep.subr.mxu0 %v1972_v10  ;;  %v2080_v9 = vunpack.c.h.bf16 %v1957_v31  ;;  %v1923_v10 = vld [vmem:[%s3478_s6 + $0xc0] sm:$0xff]  ;;  %v2077_v21 = vunpack.c.l.bf16 %v1956_v25 }
 0x3d9   : > { %2196 = vmatprep.subr.mxu1 %v2036_v16  ;;  %2126 = vmatpush1.msra.mxu0 %v1971_v5  ;;  %v1955_v16 = vld [vmem:[%s3478_s6 + $0x1c0] sm:$0xff]  ;;  %v2014_v5 = vunpack.c.h.bf16 %v1924_v4  ;;  %v2011_v22 = vunpack.c.l.bf16 %v1923_v10 }
 0x3da   : > { %2197 = vmatpush1.msra.mxu1 %v2035_v15  ;;  %2127 = vmatprep.subr.mxu0 %v1970_v48  ;;  %v2078_v15 = vunpack.c.h.bf16 %v1956_v25  ;;  %v1922_v48 = vld [vmem:[%s3478_s6 + $0xb8] sm:$0xff]  ;;  %v2075_v54 = vunpack.c.l.bf16 %v1955_v16 }
 0x3db   : > { %2198 = vmatprep.subr.mxu1 %v2034_v6  ;;  %2128 = vmatpush1.msra.mxu0 %v1969_v11  ;;  %v1954_v6 = vld [vmem:[%s3478_s6 + $0x1b8] sm:$0xff]  ;;  %v2012_v11 = vunpack.c.h.bf16 %v1923_v10  ;;  %v2009_v35 = vunpack.c.l.bf16 %v1922_v48 }
 0x3dc   : > { %2199 = vmatpush1.msra.mxu1 %v2033_v3  ;;  %2129 = vmatprep.subr.mxu0 %v1968_v8  ;;  %v2076_v3 = vunpack.c.h.bf16 %v1955_v16  ;;  %v1921_v8 = vld [vmem:[%s3478_s6 + $0xb0] sm:$0xff]  ;;  %v2073_v55 = vunpack.c.l.bf16 %v1954_v6  ;;  %v1898_v25 = vld [vmem:[%s3473_s1 + $0x18] sm:$0xff]  ;;  %v2091_v16 = vld [vmem:[%s3479_s7] sm:$0x3] }
 0x3dd   : > { %2200 = vmatprep.subr.mxu1 %v2032_v28  ;;  %2130 = vmatpush1.msra.mxu0 %v1967_v33  ;;  %v1953_v28 = vld [vmem:[%s3478_s6 + $0x1b0] sm:$0xff]  ;;  %v2010_v33 = vunpack.c.h.bf16 %v1922_v48  ;;  %v2007_v38 = vunpack.c.l.bf16 %v1921_v8 }
 0x3de   : > { %2201 = vmatpush1.msra.mxu1 %v2031_v26  ;;  %2131 = vmatprep.subr.mxu0 %v1966_v40  ;;  %v2074_v26 = vunpack.c.h.bf16 %v1954_v6  ;;  %v1920_v40 = vld [vmem:[%s3478_s6 + $0xa8] sm:$0xff]  ;;  %v2071_v39 = vunpack.c.l.bf16 %v1953_v28 }
 0x3df   : > { %2202 = vmatprep.subr.mxu1 %v2030_v36  ;;  %2132 = vmatpush1.msra.mxu0 %v1965_v27  ;;  %v1952_v36 = vld [vmem:[%s3478_s6 + $0x1a8] sm:$0xff]  ;;  %v2008_v27 = vunpack.c.h.bf16 %v1921_v8  ;;  %v2005_v44 = vunpack.c.l.bf16 %v1920_v40 }
 0x3e0   : > { %2203 = vmatpush1.msra.mxu1 %v2029_v30  ;;  %2133 = vmatprep.subr.mxu0 %v1964_v7  ;;  %v2072_v30 = vunpack.c.h.bf16 %v1953_v28  ;;  %v1919_v7 = vld [vmem:[%s3478_s6 + $0xa0] sm:$0xff]  ;;  %v2069_v17 = vunpack.c.l.bf16 %v1952_v36 }
 0x3e1   : > { %2204 = vmatprep.subr.mxu1 %v2028_v41  ;;  %2134 = vmatpush1.msra.mxu0 %v1963_v43  ;;  %v1951_v41 = vld [vmem:[%s3478_s6 + $0x1a0] sm:$0xff]  ;;  %v2006_v43 = vunpack.c.h.bf16 %v1920_v40  ;;  %v2003_v46 = vunpack.c.l.bf16 %v1919_v7 }
 0x3e2   : > { %2205 = vmatpush1.msra.mxu1 %v2027_v60  ;;  %2135 = vmatprep.subr.mxu0 %v2026_v47  ;;  %v2070_v60 = vunpack.c.h.bf16 %v1952_v36  ;;  %v1918_v47 = vld [vmem:[%s3478_s6 + $0x98] sm:$0xff]  ;;  %v2067_v51 = vunpack.c.l.bf16 %v1951_v41 }
 0x3e3   : > { %2206 = vmatprep.subr.mxu1 %v2090_v49  ;;  %2136 = vmatpush2.msra.mxu0 %v2025_v20  ;;  %v1950_v49 = vld [vmem:[%s3478_s6 + $0x198] sm:$0xff]  ;;  %v2004_v20 = vunpack.c.h.bf16 %v1919_v7  ;;  %v2001_v59 = vunpack.c.l.bf16 %v1918_v47 }
 0x3e4   : > { %2207 = vmatpush2.msra.mxu1 %v2089_v23  ;;  %2137 = vmatprep.subr.mxu0 %v2024_v52  ;;  %v2068_v23 = vunpack.c.h.bf16 %v1951_v41  ;;  %v1917_v52 = vld [vmem:[%s3478_s6 + $0x90] sm:$0xff]  ;;  %v2065_v13 = vunpack.c.l.bf16 %v1950_v49 }
 0x3e5   : > { %2208 = vmatprep.subr.mxu1 %v2088_v57  ;;  %2138 = vmatpush2.msra.mxu0 %v2023_v53  ;;  %v1949_v57 = vld [vmem:[%s3478_s6 + $0x190] sm:$0xff]  ;;  %v2002_v53 = vunpack.c.h.bf16 %v1918_v47  ;;  %v1999_v37 = vunpack.c.l.bf16 %v1917_v52 }
 0x3e6   : > { %2209 = vmatpush2.msra.mxu1 %v2087_v19  ;;  %2139 = vmatprep.subr.mxu0 %v2022_v61  ;;  %v2066_v19 = vunpack.c.h.bf16 %v1950_v49  ;;  %v1916_v61 = vld [vmem:[%s3478_s6 + $0x88] sm:$0xff]  ;;  %v2063_v42 = vunpack.c.l.bf16 %v1949_v57 }
 0x3e7   : > { %2210 = vmatprep.subr.mxu1 %v2086_v50  ;;  %2140 = vmatpush2.msra.mxu0 %v2021_v58  ;;  %v1948_v50 = vld [vmem:[%s3478_s6 + $0x188] sm:$0xff]  ;;  %v2000_v58 = vunpack.c.h.bf16 %v1917_v52  ;;  %v1997_v56 = vunpack.c.l.bf16 %v1916_v61 }
 0x3e8   : > { %2211 = vmatpush2.msra.mxu1 %v2085_v62  ;;  %2141 = vmatprep.subr.mxu0 %v2020_v63  ;;  %v2064_v62 = vunpack.c.h.bf16 %v1949_v57  ;;  %v1915_v63 = vld [vmem:[%s3478_s6 + $0x80] sm:$0xff]  ;;  %v2061_v31 = vunpack.c.l.bf16 %v1948_v50 }
 0x3e9   : > { %2212 = vmatprep.subr.mxu1 %v2084_v18  ;;  %2142 = vmatpush2.msra.mxu0 %v2019_v29  ;;  %v1947_v18 = vld [vmem:[%s3478_s6 + $0x180] sm:$0xff]  ;;  %v1998_v29 = vunpack.c.h.bf16 %v1916_v61 }
 0x3ea   : > { %2213 = vmatpush2.msra.mxu1 %v2083_v1  ;;  %2143 = vmatprep.subr.mxu0 %v2018_v24  ;;  %v2062_v1 = vunpack.c.h.bf16 %v1948_v50  ;;  %v1996_v24 = vunpack.c.h.bf16 %v1915_v63  ;;  %v2059_v4 = vunpack.c.l.bf16 %v1947_v18 }
 0x3eb   : > { %2214 = vmatprep.subr.mxu1 %v2082_v34  ;;  %2144 = vmatpush2.msra.mxu0 %v2017_v2  ;;  %v2060_v34 = vunpack.c.h.bf16 %v1947_v18  ;;  %v1995_v2 = vunpack.c.l.bf16 %v1915_v63 }
 0x3ec   : > { %2215 = vmatpush2.msra.mxu1 %v2081_v32  ;;  %2145 = vmatprep.subr.mxu0 %v2016_v0  ;;  %v1896_v32 = vld [vmem:[%s3473_s1 + $0x8] sm:$0xff]  ;;  %v1895_v0 = vld [vmem:[%s3473_s1] sm:$0xff] }
 0x3ed   : > { %2216 = vmatprep.subr.mxu1 %v2080_v9  ;;  %2146 = vmatpush2.msra.mxu0 %v2015_v45  ;;  %v1897_v9 = vld [vmem:[%s3473_s1 + $0x10] sm:$0xff]  ;;  %v2093_v45 = vlaneseq }
 0x3ee   : > { %2217 = vmatpush2.msra.mxu1 %v2079_v14  ;;  %2147 = vmatprep.subr.mxu0 %v2014_v5 }
 0x3ef   : > { %2218 = vmatprep.subr.mxu1 %v2078_v15  ;;  %2148 = vmatpush2.msra.mxu0 %v2013_v12  ;;  %v2094_v14 = vshrl.u32 %v2093_v45, 7 }
 0x3f0   : > { %2219 = vmatpush2.msra.mxu1 %v2077_v21  ;;  %2149 = vmatprep.subr.mxu0 %v2012_v11 }
 0x3f1   : > { %2220 = vmatprep.subr.mxu1 %v2076_v3  ;;  %2150 = vmatpush2.msra.mxu0 %v2011_v22  ;;  %v2095_v10 = vsub.s32 0, %v2094_v14  ;;  %v2099_v5 = vsub.s32 1, %v2094_v14 }
 0x3f2   : > { %2221 = vmatpush2.msra.mxu1 %v2075_v54  ;;  %2151 = vmatprep.subr.mxu0 %v2010_v33 }
 0x3f3   : > { %2222 = vmatprep.subr.mxu1 %v2074_v26  ;;  %2152 = vmatpush2.msra.mxu0 %v2009_v35  ;;  %v2096_v15 = vrot.slane %v2091_v16, %v2095_v10  ;;  %v2100_v12 = vrot.slane %v2091_v16, %v2099_v5 }
 0x3f4   : > { %2223 = vmatpush2.msra.mxu1 %v2073_v55  ;;  %2153 = vmatprep.subr.mxu0 %v2008_v27 }
 0x3f5   : > { %2224 = vmatprep.subr.mxu1 %v2072_v30  ;;  %2154 = vmatpush2.msra.mxu0 %v2007_v38 }
 0x3f6   : > { %2225 = vmatpush2.msra.mxu1 %v2071_v39  ;;  %2155 = vmatprep.subr.mxu0 %v2006_v43 }
 0x3f7   : > { %2226 = vmatprep.subr.mxu1 %v2070_v60  ;;  %2156 = vmatpush2.msra.mxu0 %v2005_v44 }
 0x3f8   : > { %2227 = vmatpush2.msra.mxu1 %v2069_v17  ;;  %2157 = vmatprep.subr.mxu0 %v2004_v20 }
 0x3f9   : > { %2228 = vmatprep.subr.mxu1 %v2068_v23  ;;  %2158 = vmatpush2.msra.mxu0 %v2003_v46 }
 0x3fa   : > { %2229 = vmatpush2.msra.mxu1 %v2067_v51  ;;  %2159 = vmatprep.subr.mxu0 %v2002_v53 }
 0x3fb   : > { %2230 = vmatprep.subr.mxu1 %v2066_v19  ;;  %2160 = vmatpush2.msra.mxu0 %v2001_v59 }
 0x3fc   : > { %2231 = vmatpush2.msra.mxu1 %v2065_v13  ;;  %2161 = vmatprep.subr.mxu0 %v2000_v58 }
 0x3fd   : > { %2232 = vmatprep.subr.mxu1 %v2064_v62  ;;  %2162 = vmatpush2.msra.mxu0 %v1999_v37 }
 0x3fe   : > { %2233 = vmatpush2.msra.mxu1 %v2063_v42  ;;  %2163 = vmatprep.subr.mxu0 %v1998_v29 }
 0x3ff   : > { %2234 = vmatprep.subr.mxu1 %v2062_v1  ;;  %2164 = vmatpush2.msra.mxu0 %v1997_v56 }
 0x400   : > { %2235 = vmatpush2.msra.mxu1 %v2061_v31  ;;  %2165 = vmatprep.subr.mxu0 %v1996_v24 }
 0x401   : > { %2236 = vmatprep.subr.mxu1 %v2060_v34  ;;  %2166 = vmatpush2.msra.mxu0 %v1995_v2 }
 0x402   : > { %2167 = vmatprep.mubr.f32.mxu0 %v1896_v32  ;;  %2237 = vmatpush2.msra.mxu1 %v2059_v4 }
 0x403   : > { %2238 = vmatprep.mubr.f32.mxu1 %v1898_v25  ;;  %2168 = vmatmul.mubr.f32.vlgmr.msra.gmra.mxu0 %v1895_v0 }
 0x404   : > { %2239 = vmatmul.mubr.f32.vlgmr.msra.gmra.mxu1 %v1897_v9 }
 0x4c3   : > { %v2169_v21 = vpop.f32.mrf.mxu0 }
 0x4c4   : > { %v2240_v48 = vpop.f32.mrf.mxu1  ;;  %v2170_v6 = vadd.f32 %v2169_v21, %v2096_v15 }
 0x4c5   : > { %v2171_v11 = vpop.f32.mrf.mxu0 }
 0x4c6   : > { %v2241_v3 = vadd.f32 %v2240_v48, %v2170_v6  ;;  %v2172_v22 = vadd.f32 %v2171_v11, %v2100_v12  ;;  %v2242_v54 = vpop.f32.mrf.mxu1 }
 0x4c8   : > { %v2243_v8 = vadd.f32 %v2242_v54, %v2172_v22  ;;  %v2245_v28 = vmul.f32 %v2241_v3, %v2241_v3 }
 0x4ca   : > { %v2246_v33 = vmul.f32 %v2243_v8, %v2243_v8 }
 0x4cc   : > { %v2247_v26 = vadd.f32 %v2246_v33, %v2245_v28 }
 0x4ce   : > { %2248 = vadd.xlane.f32.xlu0 %v2247_v26 }
 0x557   : > { %v2249_v35 = vpop.xlane.xlu0 %2248 }
 0x558   : > { %v2251_v55 = vmax.f32 %v2249_v35, 1e-24  ;;  %vm2250_vm1 = vcmp.gt.f32.partialorder %v2249_v35, 1e-24 }
 0x55a   : > { %2428 = vrsqrt.f32 %v2251_v55 }
 0x567   : > { %v2429_v40 = vpop.eup %2428 }
 0x568   : > { %v2253_v36 = vsel %vm2250_vm1, %v2429_v40, 1e+12 }
 0x569   : > { %v2254_v27 = vmul.f32 %v2253_v36, %v2241_v3  ;;  %v2255_v30 = vmul.f32 %v2253_v36, %v2243_v8 }
 0x56b   : > { %2256 = vst [vmem:[%s2698_s22] sm:$0xff] %v2254_v27  ;;  %2257 = vst [vmem:[%s2698_s22 + $0x8] sm:$0xff] %v2255_v30 }
 0x56c PF: > { %s2360_s13 = sshll.u32 %s2626_s9, 8  ;;  %s2273_s20 = sshll.u32 %s2698_s22, 4  ;;  %s2274_s20 = int_to_ptr.vmem [resolvable:$true] %s2273_s20 }
 0x56d   : > { %s2271_s23 = scalar_lea.hbm %s3480_s8, %s2360_s13  ;;  %s2259_s17 = scalar_lea.sflag [#allocation4], %s311_s19 }
 0x56e   : > { %s2482_s24 = scalar_lea.vmem %s2274_s20, 256  ;;  %s2559_s25 = smov [#allocation7]  }
 0x56f   : > { %p2483_p0 = scmp.ne.s32.totalorder %s2274_s20, %s2482_s24  ;;  %s2486_s26 = sshll.u32 %s2559_s25, 4  ;;  %s2487_s26 = int_to_ptr.vmem [resolvable:$false] %s2486_s26 }
 0x570   : > { %s2488_s10 = scalar_lea.vmem %s2487_s26, 512  ;;  %p2489_p1 = scmp.lt.s32.totalorder %s2274_s20, %s2487_s26 }
 0x571   : > { %p2484_p8 = pnand %p2483_p0, %p2643_p5  ;;  %p2490_p2 = scmp.lt.s32.totalorder %s2488_s10, %s2482_s24 }
 0x573   : > { %p2485_p12 = pneg %p2484_p8  ;;  %p2491_p4 = por %p2490_p2, %p2489_p1 }
 0x575   : > { %p2492_p3 = pnand %p2491_p4, %p2485_p12 }
 0x577   : > { %2495 = shalt.err (!%p2492_p3)
}
 0x578   : > { %s2496_s9 = scalar_lea.hbm %s2271_s23, 256  ;;  %s2500_s12 = scalar_lea.hbm %s3480_s8, 512 }
 0x579   : > { %p2497_p7 = scmp.ne.s32.totalorder %s2271_s23, %s2496_s9  ;;  %p2501_p10 = scmp.lt.s32.totalorder %s2271_s23, %s3480_s8 }
 0x57a   : > { %p2502_p11 = scmp.lt.s32.totalorder %s2500_s12, %s2496_s9 }
 0x57b   : > { %p2498_p9 = pnand %p2497_p7, %p2643_p5 }
 0x57c   : > { %p2503_p13 = por %p2502_p11, %p2501_p10 }
 0x57d   : > { %p2499_p6 = pneg %p2498_p9 }
 0x57f   : > { %p2504_p0 = pnand %p2503_p13, %p2499_p6 }
 0x581   : > { %2507 = shalt.err (!%p2504_p0)
}
 0x582   : > { %2369 = dma.vmem_to_hbm [thread:$0]  (%p2643_p5), %s2274_s20, 256, %s2271_s23, %s2259_s17  }
 0x583 PF: > { %p2386_p8 = scmp.ge.s32.totalorder %s2550_s30, 2  ;;  %s2285_s21 = sand.u32 1, %s2538_s27  }
 0x584   : > { %p3491_p12 = scmp.ne.s32.totalorder %s3483_s16, 0  ;;  %s2286_s24 = scalar_lea.sflag [#allocation4], %s2285_s21 }
 0x586   : > { %p2379_p1 = pnand %p2386_p8, %p3491_p12 }
 0x588   : > { %p2380_p2 = pneg %p2379_p1 }
 0x58a   : > { %2533 = dma.done.wait (%p2380_p2), %s2286_s24, 256  }
 0x58b   : > { %2535 = vsyncadd (%p2380_p2), %s2286_s24, 4294967040  ;;  %p20_p4 = scmp.ge.s32.totalorder %s2630_s11, 4   ;;  %s3492_s27 = smov %s2542_s28 }
 0x58c   : > { %s3493_s28 = smov %s2546_s29  ;;  %s3494_s29 = smov %s2641_s14 }
 0x58d   : > { %s3495_s30 = smov %s2630_s11  ;;  %22 = sbr.rel (!%p20_p4) target bundleno = 5 (0x5), region = 101 }
 0x592   :  { %2291 = vsyncpa [#allocation3], 1 }
 0x593   :  { %2293 = vsyncpa [#allocation3 + $0x1], 1 }
 0x594   :  { %2294 = vsyncpa [#allocation6], 1 }
 0x595   :  { %2295 = vsyncpa [#allocation4], 1 }
 0x596   :  { %2297 = vsyncpa [#allocation4 + $0x1], 1 }

</bundles_post_ra>
